<compile_context>
chip_gen: v5e
topology: v5e:2x2
jax: 0.10.0
libtpu: 0.0.40
codegen_flags: <defaults>
</compile_context>

<pallas_src>
import functools
import math

import jax
import jax.numpy as jnp
from jax.experimental import pallas as pl
from jax.experimental.pallas import tpu as pltpu


# ----------------------------- in-kernel helpers -----------------------------

def _layer_norm(x, gamma, beta, eps=1e-5):
    # Matches LayerNormalization: mean/var over last dim, (x-mean)/sqrt(var+eps).
    mean = jnp.mean(x, axis=-1, keepdims=True)
    var = jnp.mean((x - mean) ** 2, axis=-1, keepdims=True)
    return gamma * ((x - mean) * jax.lax.rsqrt(var + eps)) + beta


def _attend(q, k, v, mask, num_heads):
    """q/k/v: (S, D) head-major along the lane axis (scale already folded in q).
    mask: (S, S) additive.  Returns lane-dense (S, D), heads concatenated."""
    S, D = q.shape
    dh = D // num_heads
    outs = []
    for h in range(num_heads):                     # fully unrolled, no grid steps
        sl = slice(h * dh, (h + 1) * dh)
        qh, kh, vh = q[:, sl], k[:, sl], v[:, sl]
        # q @ k^T without transposing k (contract last dims on the MXU).
        s = jax.lax.dot_general(qh, kh, (((1,), (1,)), ((), ())),
                                preferred_element_type=jnp.float32)
        s = s + mask
        m = jnp.max(s, axis=-1, keepdims=True)
        p = jnp.exp(s - m)
        l = jnp.sum(p, axis=-1, keepdims=True)
        a = p * pl.reciprocal(l, approx=True)      # EUP reciprocal, no VALU divide
        outs.append(jnp.dot(a, vh, preferred_element_type=jnp.float32))
    return jnp.concatenate(outs, axis=-1)          # (S, D) lane-dense, head-major


# ------------------------------- fused kernel --------------------------------

def _decoder_layer_kernel(
    x_ref, y_ref, self_mask_ref, cross_mask_ref,
    # self-attention + LN1
    w_qkv_sa_ref, b_qkv_sa_ref, w_o_sa_ref, b_o_sa_ref, g1_ref, be1_ref,
    # cross-attention + LN2
    w_kv_ca_ref, b_kv_ca_ref, w_q_ca_ref, b_q_ca_ref, w_o_ca_ref, b_o_ca_ref,
    g2_ref, be2_ref,
    # FFN + LN3
    w1_ref, b1_ref, w2_ref, b2_ref, g3_ref, be3_ref,
    out_ref, *, num_heads):
    x = x_ref[0]                                   # (S, D) encoder stream
    y = y_ref[0]                                   # (S, D) decoder stream
    D = y.shape[-1]

    # ---------------- self attention ----------------
    qkv = jnp.dot(y, w_qkv_sa_ref[...],
                  preferred_element_type=jnp.float32) + b_qkv_sa_ref[...]
    q, k, v = qkv[:, :D], qkv[:, D:2 * D], qkv[:, 2 * D:]
    sa = _attend(q, k, v, self_mask_ref[...], num_heads)
    sa = jnp.dot(sa, w_o_sa_ref[...],
                 preferred_element_type=jnp.float32) + b_o_sa_ref[...]
    y1 = _layer_norm(sa + y, g1_ref[...], be1_ref[...])

    # ---------------- cross attention (kv from x, q from y1) ----------------
    kv = jnp.dot(x, w_kv_ca_ref[...],
                 preferred_element_type=jnp.float32) + b_kv_ca_ref[...]
    k2, v2 = kv[:, :D], kv[:, D:]
    q2 = jnp.dot(y1, w_q_ca_ref[...],
                 preferred_element_type=jnp.float32) + b_q_ca_ref[...]
    ca = _attend(q2, k2, v2, cross_mask_ref[...], num_heads)
    ca = jnp.dot(ca, w_o_ca_ref[...],
                 preferred_element_type=jnp.float32) + b_o_ca_ref[...]
    y2 = _layer_norm(ca + y1, g2_ref[...], be2_ref[...])

    # ---------------- position-wise FFN ----------------
    h = jnp.dot(y2, w1_ref[...], preferred_element_type=jnp.float32) + b1_ref[...]
    h = jnp.maximum(h, 0.0)
    f = jnp.dot(h, w2_ref[...], preferred_element_type=jnp.float32) + b2_ref[...]

    out_ref[0] = _layer_norm(f + y2, g3_ref[...], be3_ref[...])


# ------------------------------ param preparation -----------------------------

def prepare_params(params, d_model, num_heads):
    """One-time host-side prep: permute fused projection columns so the kernel
    sees [q | k | v] (each head-major along lanes), fold 1/sqrt(d_k) into the
    q projections, and reshape biases/gamma/beta to 2-D rows."""
    dh = d_model // num_heads
    scale = 1.0 / math.sqrt(dh)
    # [head, part, dim] -> [part, head, dim]
    perm3 = jnp.arange(3 * d_model).reshape(num_heads, 3, dh).transpose(1, 0, 2).reshape(-1)
    perm2 = jnp.arange(2 * d_model).reshape(num_heads, 2, dh).transpose(1, 0, 2).reshape(-1)

    w_qkv = params["sa_w_qkv"][:, perm3]
    b_qkv = params["sa_b_qkv"][perm3]
    w_qkv = w_qkv.at[:, :d_model].multiply(scale)     # fold 1/sqrt(d_k) into q
    b_qkv = b_qkv.at[:d_model].multiply(scale)

    w_kv = params["ca_w_kv"][:, perm2]
    b_kv = params["ca_b_kv"][perm2]
    w_q = params["ca_w_q"] * scale                    # fold 1/sqrt(d_k) into q
    b_q = params["ca_b_q"] * scale

    row = lambda a: a.reshape(1, -1)
    return (
        w_qkv, row(b_qkv), params["sa_w_o"], row(params["sa_b_o"]),
        row(params["g1"]), row(params["be1"]),
        w_kv, row(b_kv), w_q, row(b_q), params["ca_w_o"], row(params["ca_b_o"]),
        row(params["g2"]), row(params["be2"]),
        params["w1"], row(params["b1"]), params["w2"], row(params["b2"]),
        row(params["g3"]), row(params["be3"]),
    )


# --------------------------------- wrapper ------------------------------------

def decoder_layer_forward(x, y, self_mask, cross_mask, kernel_params, num_heads):
    B, S, D = y.shape

    def pinned(shape):
        # Same block for every grid step -> fetched once, stays in VMEM.
        return pl.BlockSpec(shape, lambda b: (0,) * len(shape))

    in_specs = [
        pl.BlockSpec((1, S, D), lambda b: (b, 0, 0)),    # x
        pl.BlockSpec((1, S, D), lambda b: (b, 0, 0)),    # y
        pinned(self_mask.shape),
        pinned(cross_mask.shape),
    ] + [pinned(w.shape) for w in kernel_params]

    return pl.pallas_call(
        functools.partial(_decoder_layer_kernel, num_heads=num_heads),
        out_shape=jax.ShapeDtypeStruct((B, S, D), jnp.float32),
        grid_spec=pltpu.PrefetchScalarGridSpec(
            num_scalar_prefetch=0,
            grid=(B,),
            in_specs=in_specs,
            out_specs=pl.BlockSpec((1, S, D), lambda b: (b, 0, 0)),
        ),
        compiler_params=pltpu.CompilerParams(
            dimension_semantics=("parallel",)),
    )(x, y, self_mask, cross_mask, *kernel_params)


# ------------------------------- pure-JAX reference ----------------------------

def _scaled_dot_product_ref(q, k, v, mask):
    d_k = q.shape[-1]
    s = jnp.einsum("bhqd,bhkd->bhqk", q, k) / math.sqrt(d_k)
    s = s + mask                      # == permute/+mask/permute in the PyTorch code
    a = jax.nn.softmax(s, axis=-1)
    return jnp.einsum("bhqk,bhkd->bhqd", a, v)


def _mha_ref(x, mask, w_qkv, b_qkv, w_o, b_o, num_heads):
    B, S, D = x.shape
    dh = D // num_heads
    qkv = x @ w_qkv + b_qkv
    qkv = qkv.reshape(B, S, num_heads, 3 * dh).transpose(0, 2, 1, 3)
    q, k, v = jnp.split(qkv, 3, axis=-1)
    vals = _scaled_dot_product_ref(q, k, v, mask)
    vals = vals.transpose(0, 2, 1, 3).reshape(B, S, D)
    return vals @ w_o + b_o


def _cross_mha_ref(x, y, mask, w_kv, b_kv, w_q, b_q, w_o, b_o, num_heads):
    B, S, D = x.shape
    dh = D // num_heads
    kv = x @ w_kv + b_kv
    q = y @ w_q + b_q
    kv = kv.reshape(B, S, num_heads, 2 * dh).transpose(0, 2, 1, 3)
    q = q.reshape(B, S, num_heads, dh).transpose(0, 2, 1, 3)
    k, v = jnp.split(kv, 2, axis=-1)
    vals = _scaled_dot_product_ref(q, k, v, mask)
    vals = vals.transpose(0, 2, 1, 3).reshape(B, S, D)
    return vals @ w_o + b_o


def _layer_norm_ref(x, gamma, beta, eps=1e-5):
    mean = x.mean(-1, keepdims=True)
    var = ((x - mean) ** 2).mean(-1, keepdims=True)
    return gamma * (x - mean) / jnp.sqrt(var + eps) + beta


def _decoder_layer_ref(x, y, self_mask, cross_mask, p, num_heads):
    _y = y
    y = _mha_ref(y, self_mask, p["sa_w_qkv"], p["sa_b_qkv"],
                 p["sa_w_o"], p["sa_b_o"], num_heads)
    y = _layer_norm_ref(y + _y, p["g1"], p["be1"])
    _y = y
    y = _cross_mha_ref(x, y, cross_mask, p["ca_w_kv"], p["ca_b_kv"],
                       p["ca_w_q"], p["ca_b_q"], p["ca_w_o"], p["ca_b_o"], num_heads)
    y = _layer_norm_ref(y + _y, p["g2"], p["be2"])
    _y = y
    h = jnp.maximum(y @ p["w1"] + p["b1"], 0.0)
    y = h @ p["w2"] + p["b2"]
    return _layer_norm_ref(y + _y, p["g3"], p["be3"])


# ----------------------------------- main --------------------------------------

if __name__ == "__main__":
    B, S, D, H, HID = 2, 8, 32, 4, 64   # batch, seq, d_model, heads, ffn_hidden

    key = jax.random.PRNGKey(0)
    kit = iter(jax.random.split(key, 24))

    def lin(fan_in, fan_out):
        bound = 1.0 / math.sqrt(fan_in)
        w = jax.random.uniform(next(kit), (fan_in, fan_out), jnp.float32, -bound, bound)
        b = jax.random.uniform(next(kit), (fan_out,), jnp.float32, -bound, bound)
        return w, b

    x = jax.random.normal(next(kit), (B, S, D), dtype=jnp.float32)   # encoder out
    y = jax.random.normal(next(kit), (B, S, D), dtype=jnp.float32)   # decoder in

    sa_w_qkv, sa_b_qkv = lin(D, 3 * D)
    sa_w_o, sa_b_o = lin(D, D)
    ca_w_kv, ca_b_kv = lin(D, 2 * D)
    ca_w_q, ca_b_q = lin(D, D)
    ca_w_o, ca_b_o = lin(D, D)
    w1, b1 = lin(D, HID)
    w2, b2 = lin(HID, D)

    def ln_params():
        g = 1.0 + 0.1 * jax.random.normal(next(kit), (D,), jnp.float32)
        b = 0.1 * jax.random.normal(next(kit), (D,), jnp.float32)
        return g, b

    g1, be1 = ln_params()
    g2, be2 = ln_params()
    g3, be3 = ln_params()

    params = dict(
        sa_w_qkv=sa_w_qkv, sa_b_qkv=sa_b_qkv, sa_w_o=sa_w_o, sa_b_o=sa_b_o,
        ca_w_kv=ca_w_kv, ca_b_kv=ca_b_kv, ca_w_q=ca_w_q, ca_b_q=ca_b_q,
        ca_w_o=ca_w_o, ca_b_o=ca_b_o,
        w1=w1, b1=b1, w2=w2, b2=b2,
        g1=g1, be1=be1, g2=g2, be2=be2, g3=g3, be3=be3,
    )

    # Additive masks (broadcast over batch & heads, as in the PyTorch reference).
    causal = jnp.tril(jnp.ones((S, S), dtype=bool))
    self_mask = jnp.where(causal, 0.0, -1e9).astype(jnp.float32)
    cross_mask = jnp.zeros((S, S), jnp.float32).at[:, S - 2:].set(-1e9)

    kernel_params = prepare_params(params, D, H)   # one-time prep (permute + scale)

    out = decoder_layer_forward(x, y, self_mask, cross_mask, kernel_params, num_heads=H)
    out = jax.block_until_ready(out)

    ref = _decoder_layer_ref(x, y, self_mask, cross_mask, params, num_heads=H)
    assert out.shape == (B, S, D)
    assert jnp.allclose(out, ref, atol=2e-3, rtol=2e-3), float(jnp.max(jnp.abs(out - ref)))

    print("KERNEL_OK")
</pallas_src>

<mosaic_0001>
module attributes {stable_mosaic.version = 11 : i64} {
  func.func @_decoder_layer_kernel(%arg0: i32, %arg1: memref<1x8x32xf32, #tpu.memory_space<vmem>>, %arg2: memref<1x8x32xf32, #tpu.memory_space<vmem>>, %arg3: memref<8x8xf32, #tpu.memory_space<vmem>>, %arg4: memref<8x8xf32, #tpu.memory_space<vmem>>, %arg5: memref<32x96xf32, #tpu.memory_space<vmem>>, %arg6: memref<1x96xf32, #tpu.memory_space<vmem>>, %arg7: memref<32x32xf32, #tpu.memory_space<vmem>>, %arg8: memref<1x32xf32, #tpu.memory_space<vmem>>, %arg9: memref<1x32xf32, #tpu.memory_space<vmem>>, %arg10: memref<1x32xf32, #tpu.memory_space<vmem>>, %arg11: memref<32x64xf32, #tpu.memory_space<vmem>>, %arg12: memref<1x64xf32, #tpu.memory_space<vmem>>, %arg13: memref<32x32xf32, #tpu.memory_space<vmem>>, %arg14: memref<1x32xf32, #tpu.memory_space<vmem>>, %arg15: memref<32x32xf32, #tpu.memory_space<vmem>>, %arg16: memref<1x32xf32, #tpu.memory_space<vmem>>, %arg17: memref<1x32xf32, #tpu.memory_space<vmem>>, %arg18: memref<1x32xf32, #tpu.memory_space<vmem>>, %arg19: memref<32x64xf32, #tpu.memory_space<vmem>>, %arg20: memref<1x64xf32, #tpu.memory_space<vmem>>, %arg21: memref<64x32xf32, #tpu.memory_space<vmem>>, %arg22: memref<1x32xf32, #tpu.memory_space<vmem>>, %arg23: memref<1x32xf32, #tpu.memory_space<vmem>>, %arg24: memref<1x32xf32, #tpu.memory_space<vmem>>, %arg25: memref<1x8x32xf32, #tpu.memory_space<vmem>>) attributes {dimension_semantics = [#tpu.dimension_semantics<parallel>], iteration_bounds = array<i64: 2>, scalar_prefetch = 0 : i64, scratch_operands = 0 : i64, tpu.core_type = #tpu.core_type<tc>, window_params = [{transform_indices = @transform_0, window_bounds = array<i64: 1, 8, 32>}, {transform_indices = @transform_1, window_bounds = array<i64: 1, 8, 32>}, {pipeline_mode = #tpu.pipeline_mode<synchronous>, transform_indices = @transform_2, window_bounds = array<i64: 8, 8>}, {pipeline_mode = #tpu.pipeline_mode<synchronous>, transform_indices = @transform_3, window_bounds = array<i64: 8, 8>}, {pipeline_mode = #tpu.pipeline_mode<synchronous>, transform_indices = @transform_4, window_bounds = array<i64: 32, 96>}, {pipeline_mode = #tpu.pipeline_mode<synchronous>, transform_indices = @transform_5, window_bounds = array<i64: 1, 96>}, {pipeline_mode = #tpu.pipeline_mode<synchronous>, transform_indices = @transform_6, window_bounds = array<i64: 32, 32>}, {pipeline_mode = #tpu.pipeline_mode<synchronous>, transform_indices = @transform_7, window_bounds = array<i64: 1, 32>}, {pipeline_mode = #tpu.pipeline_mode<synchronous>, transform_indices = @transform_8, window_bounds = array<i64: 1, 32>}, {pipeline_mode = #tpu.pipeline_mode<synchronous>, transform_indices = @transform_9, window_bounds = array<i64: 1, 32>}, {pipeline_mode = #tpu.pipeline_mode<synchronous>, transform_indices = @transform_10, window_bounds = array<i64: 32, 64>}, {pipeline_mode = #tpu.pipeline_mode<synchronous>, transform_indices = @transform_11, window_bounds = array<i64: 1, 64>}, {pipeline_mode = #tpu.pipeline_mode<synchronous>, transform_indices = @transform_12, window_bounds = array<i64: 32, 32>}, {pipeline_mode = #tpu.pipeline_mode<synchronous>, transform_indices = @transform_13, window_bounds = array<i64: 1, 32>}, {pipeline_mode = #tpu.pipeline_mode<synchronous>, transform_indices = @transform_14, window_bounds = array<i64: 32, 32>}, {pipeline_mode = #tpu.pipeline_mode<synchronous>, transform_indices = @transform_15, window_bounds = array<i64: 1, 32>}, {pipeline_mode = #tpu.pipeline_mode<synchronous>, transform_indices = @transform_16, window_bounds = array<i64: 1, 32>}, {pipeline_mode = #tpu.pipeline_mode<synchronous>, transform_indices = @transform_17, window_bounds = array<i64: 1, 32>}, {pipeline_mode = #tpu.pipeline_mode<synchronous>, transform_indices = @transform_18, window_bounds = array<i64: 32, 64>}, {pipeline_mode = #tpu.pipeline_mode<synchronous>, transform_indices = @transform_19, window_bounds = array<i64: 1, 64>}, {pipeline_mode = #tpu.pipeline_mode<synchronous>, transform_indices = @transform_20, window_bounds = array<i64: 64, 32>}, {pipeline_mode = #tpu.pipeline_mode<synchronous>, transform_indices = @transform_21, window_bounds = array<i64: 1, 32>}, {pipeline_mode = #tpu.pipeline_mode<synchronous>, transform_indices = @transform_22, window_bounds = array<i64: 1, 32>}, {pipeline_mode = #tpu.pipeline_mode<synchronous>, transform_indices = @transform_23, window_bounds = array<i64: 1, 32>}, {transform_indices = @transform_24, window_bounds = array<i64: 1, 8, 32>}]} {
    %c0 = arith.constant 0 : index
    %c0_0 = arith.constant 0 : index
    %c0_1 = arith.constant 0 : index
    %0 = vector.load %arg1[%c0, %c0_0, %c0_1] : memref<1x8x32xf32, #tpu.memory_space<vmem>>, vector<1x8x32xf32>
    %1 = vector.shape_cast %0 : vector<1x8x32xf32> to vector<8x32xf32>
    %c0_2 = arith.constant 0 : index
    %c0_3 = arith.constant 0 : index
    %c0_4 = arith.constant 0 : index
    %2 = vector.load %arg2[%c0_2, %c0_3, %c0_4] : memref<1x8x32xf32, #tpu.memory_space<vmem>>, vector<1x8x32xf32>
    %3 = vector.shape_cast %2 : vector<1x8x32xf32> to vector<8x32xf32>
    %c0_5 = arith.constant 0 : index
    %c0_6 = arith.constant 0 : index
    %4 = vector.load %arg5[%c0_5, %c0_6] : memref<32x96xf32, #tpu.memory_space<vmem>>, vector<32x96xf32>
    %cst = arith.constant dense<0.000000e+00> : vector<8x96xf32>
    %5 = tpu.matmul %3, %4, %cst {dimension_numbers = #tpu.dot_dimension_numbers<[1], [0], [0], [1], [0, 0, 1, 1], [], []>} : vector<8x32xf32>, vector<32x96xf32>, vector<8x96xf32> -> vector<8x96xf32>
    %c0_7 = arith.constant 0 : index
    %c0_8 = arith.constant 0 : index
    %6 = vector.load %arg6[%c0_7, %c0_8] : memref<1x96xf32, #tpu.memory_space<vmem>>, vector<1x96xf32>
    %7 = vector.broadcast %6 : vector<1x96xf32> to vector<8x96xf32>
    %8 = arith.addf %5, %7 : vector<8x96xf32>
    %9 = vector.extract_strided_slice %8 {offsets = [0, 0], sizes = [8, 32], strides = [1, 1]} : vector<8x96xf32> to vector<8x32xf32>
    %10 = vector.extract_strided_slice %8 {offsets = [0, 32], sizes = [8, 32], strides = [1, 1]} : vector<8x96xf32> to vector<8x32xf32>
    %11 = vector.extract_strided_slice %8 {offsets = [0, 64], sizes = [8, 32], strides = [1, 1]} : vector<8x96xf32> to vector<8x32xf32>
    %c0_9 = arith.constant 0 : index
    %c0_10 = arith.constant 0 : index
    %12 = vector.load %arg3[%c0_9, %c0_10] : memref<8x8xf32, #tpu.memory_space<vmem>>, vector<8x8xf32>
    %13 = vector.extract_strided_slice %9 {offsets = [0, 0], sizes = [8, 8], strides = [1, 1]} : vector<8x32xf32> to vector<8x8xf32>
    %14 = vector.extract_strided_slice %10 {offsets = [0, 0], sizes = [8, 8], strides = [1, 1]} : vector<8x32xf32> to vector<8x8xf32>
    %15 = vector.extract_strided_slice %11 {offsets = [0, 0], sizes = [8, 8], strides = [1, 1]} : vector<8x32xf32> to vector<8x8xf32>
    %cst_11 = arith.constant dense<0.000000e+00> : vector<8x8xf32>
    %16 = tpu.matmul %13, %14, %cst_11 {dimension_numbers = #tpu.dot_dimension_numbers<[1], [1], [0], [0], [0, 0, 1, 0], [], []>} : vector<8x8xf32>, vector<8x8xf32>, vector<8x8xf32> -> vector<8x8xf32>
    %17 = arith.addf %16, %12 : vector<8x8xf32>
    %cst_12 = arith.constant dense<0xFF800000> : vector<8xf32>
    %18 = vector.multi_reduction <maximumf>, %17, %cst_12 [1] : vector<8x8xf32> to vector<8xf32>
    %19 = vector.shape_cast %18 : vector<8xf32> to vector<8x1xf32>
    %20 = vector.broadcast %19 : vector<8x1xf32> to vector<8x8xf32>
    %21 = arith.subf %17, %20 : vector<8x8xf32>
    %22 = math.exp %21 : vector<8x8xf32>
    %cst_13 = arith.constant dense<0.000000e+00> : vector<8xf32>
    %23 = vector.multi_reduction <add>, %22, %cst_13 [1] : vector<8x8xf32> to vector<8xf32>
    %24 = vector.shape_cast %23 : vector<8xf32> to vector<8x1xf32>
    %25 = tpu.reciprocal %24 {approx = true} : vector<8x1xf32> -> vector<8x1xf32>
    %26 = vector.broadcast %25 : vector<8x1xf32> to vector<8x8xf32>
    %27 = arith.mulf %22, %26 : vector<8x8xf32>
    %cst_14 = arith.constant dense<0.000000e+00> : vector<8x8xf32>
    %28 = tpu.matmul %27, %15, %cst_14 {dimension_numbers = #tpu.dot_dimension_numbers<[1], [0], [0], [1], [0, 0, 1, 1], [], []>} : vector<8x8xf32>, vector<8x8xf32>, vector<8x8xf32> -> vector<8x8xf32>
    %29 = vector.extract_strided_slice %9 {offsets = [0, 8], sizes = [8, 8], strides = [1, 1]} : vector<8x32xf32> to vector<8x8xf32>
    %30 = vector.extract_strided_slice %10 {offsets = [0, 8], sizes = [8, 8], strides = [1, 1]} : vector<8x32xf32> to vector<8x8xf32>
    %31 = vector.extract_strided_slice %11 {offsets = [0, 8], sizes = [8, 8], strides = [1, 1]} : vector<8x32xf32> to vector<8x8xf32>
    %cst_15 = arith.constant dense<0.000000e+00> : vector<8x8xf32>
    %32 = tpu.matmul %29, %30, %cst_15 {dimension_numbers = #tpu.dot_dimension_numbers<[1], [1], [0], [0], [0, 0, 1, 0], [], []>} : vector<8x8xf32>, vector<8x8xf32>, vector<8x8xf32> -> vector<8x8xf32>
    %33 = arith.addf %32, %12 : vector<8x8xf32>
    %cst_16 = arith.constant dense<0xFF800000> : vector<8xf32>
    %34 = vector.multi_reduction <maximumf>, %33, %cst_16 [1] : vector<8x8xf32> to vector<8xf32>
    %35 = vector.shape_cast %34 : vector<8xf32> to vector<8x1xf32>
    %36 = vector.broadcast %35 : vector<8x1xf32> to vector<8x8xf32>
    %37 = arith.subf %33, %36 : vector<8x8xf32>
    %38 = math.exp %37 : vector<8x8xf32>
    %cst_17 = arith.constant dense<0.000000e+00> : vector<8xf32>
    %39 = vector.multi_reduction <add>, %38, %cst_17 [1] : vector<8x8xf32> to vector<8xf32>
    %40 = vector.shape_cast %39 : vector<8xf32> to vector<8x1xf32>
    %41 = tpu.reciprocal %40 {approx = true} : vector<8x1xf32> -> vector<8x1xf32>
    %42 = vector.broadcast %41 : vector<8x1xf32> to vector<8x8xf32>
    %43 = arith.mulf %38, %42 : vector<8x8xf32>
    %cst_18 = arith.constant dense<0.000000e+00> : vector<8x8xf32>
    %44 = tpu.matmul %43, %31, %cst_18 {dimension_numbers = #tpu.dot_dimension_numbers<[1], [0], [0], [1], [0, 0, 1, 1], [], []>} : vector<8x8xf32>, vector<8x8xf32>, vector<8x8xf32> -> vector<8x8xf32>
    %45 = vector.extract_strided_slice %9 {offsets = [0, 16], sizes = [8, 8], strides = [1, 1]} : vector<8x32xf32> to vector<8x8xf32>
    %46 = vector.extract_strided_slice %10 {offsets = [0, 16], sizes = [8, 8], strides = [1, 1]} : vector<8x32xf32> to vector<8x8xf32>
    %47 = vector.extract_strided_slice %11 {offsets = [0, 16], sizes = [8, 8], strides = [1, 1]} : vector<8x32xf32> to vector<8x8xf32>
    %cst_19 = arith.constant dense<0.000000e+00> : vector<8x8xf32>
    %48 = tpu.matmul %45, %46, %cst_19 {dimension_numbers = #tpu.dot_dimension_numbers<[1], [1], [0], [0], [0, 0, 1, 0], [], []>} : vector<8x8xf32>, vector<8x8xf32>, vector<8x8xf32> -> vector<8x8xf32>
    %49 = arith.addf %48, %12 : vector<8x8xf32>
    %cst_20 = arith.constant dense<0xFF800000> : vector<8xf32>
    %50 = vector.multi_reduction <maximumf>, %49, %cst_20 [1] : vector<8x8xf32> to vector<8xf32>
    %51 = vector.shape_cast %50 : vector<8xf32> to vector<8x1xf32>
    %52 = vector.broadcast %51 : vector<8x1xf32> to vector<8x8xf32>
    %53 = arith.subf %49, %52 : vector<8x8xf32>
    %54 = math.exp %53 : vector<8x8xf32>
    %cst_21 = arith.constant dense<0.000000e+00> : vector<8xf32>
    %55 = vector.multi_reduction <add>, %54, %cst_21 [1] : vector<8x8xf32> to vector<8xf32>
    %56 = vector.shape_cast %55 : vector<8xf32> to vector<8x1xf32>
    %57 = tpu.reciprocal %56 {approx = true} : vector<8x1xf32> -> vector<8x1xf32>
    %58 = vector.broadcast %57 : vector<8x1xf32> to vector<8x8xf32>
    %59 = arith.mulf %54, %58 : vector<8x8xf32>
    %cst_22 = arith.constant dense<0.000000e+00> : vector<8x8xf32>
    %60 = tpu.matmul %59, %47, %cst_22 {dimension_numbers = #tpu.dot_dimension_numbers<[1], [0], [0], [1], [0, 0, 1, 1], [], []>} : vector<8x8xf32>, vector<8x8xf32>, vector<8x8xf32> -> vector<8x8xf32>
    %61 = vector.extract_strided_slice %9 {offsets = [0, 24], sizes = [8, 8], strides = [1, 1]} : vector<8x32xf32> to vector<8x8xf32>
    %62 = vector.extract_strided_slice %10 {offsets = [0, 24], sizes = [8, 8], strides = [1, 1]} : vector<8x32xf32> to vector<8x8xf32>
    %63 = vector.extract_strided_slice %11 {offsets = [0, 24], sizes = [8, 8], strides = [1, 1]} : vector<8x32xf32> to vector<8x8xf32>
    %cst_23 = arith.constant dense<0.000000e+00> : vector<8x8xf32>
    %64 = tpu.matmul %61, %62, %cst_23 {dimension_numbers = #tpu.dot_dimension_numbers<[1], [1], [0], [0], [0, 0, 1, 0], [], []>} : vector<8x8xf32>, vector<8x8xf32>, vector<8x8xf32> -> vector<8x8xf32>
    %65 = arith.addf %64, %12 : vector<8x8xf32>
    %cst_24 = arith.constant dense<0xFF800000> : vector<8xf32>
    %66 = vector.multi_reduction <maximumf>, %65, %cst_24 [1] : vector<8x8xf32> to vector<8xf32>
    %67 = vector.shape_cast %66 : vector<8xf32> to vector<8x1xf32>
    %68 = vector.broadcast %67 : vector<8x1xf32> to vector<8x8xf32>
    %69 = arith.subf %65, %68 : vector<8x8xf32>
    %70 = math.exp %69 : vector<8x8xf32>
    %cst_25 = arith.constant dense<0.000000e+00> : vector<8xf32>
    %71 = vector.multi_reduction <add>, %70, %cst_25 [1] : vector<8x8xf32> to vector<8xf32>
    %72 = vector.shape_cast %71 : vector<8xf32> to vector<8x1xf32>
    %73 = tpu.reciprocal %72 {approx = true} : vector<8x1xf32> -> vector<8x1xf32>
    %74 = vector.broadcast %73 : vector<8x1xf32> to vector<8x8xf32>
    %75 = arith.mulf %70, %74 : vector<8x8xf32>
    %cst_26 = arith.constant dense<0.000000e+00> : vector<8x8xf32>
    %76 = tpu.matmul %75, %63, %cst_26 {dimension_numbers = #tpu.dot_dimension_numbers<[1], [0], [0], [1], [0, 0, 1, 1], [], []>} : vector<8x8xf32>, vector<8x8xf32>, vector<8x8xf32> -> vector<8x8xf32>
    %77 = tpu.concatenate %28, %44, %60, %76 in 1 : vector<8x8xf32>, vector<8x8xf32>, vector<8x8xf32>, vector<8x8xf32> -> vector<8x32xf32>
    %c0_27 = arith.constant 0 : index
    %c0_28 = arith.constant 0 : index
    %78 = vector.load %arg7[%c0_27, %c0_28] : memref<32x32xf32, #tpu.memory_space<vmem>>, vector<32x32xf32>
    %cst_29 = arith.constant dense<0.000000e+00> : vector<8x32xf32>
    %79 = tpu.matmul %77, %78, %cst_29 {dimension_numbers = #tpu.dot_dimension_numbers<[1], [0], [0], [1], [0, 0, 1, 1], [], []>} : vector<8x32xf32>, vector<32x32xf32>, vector<8x32xf32> -> vector<8x32xf32>
    %c0_30 = arith.constant 0 : index
    %c0_31 = arith.constant 0 : index
    %80 = vector.load %arg8[%c0_30, %c0_31] : memref<1x32xf32, #tpu.memory_space<vmem>>, vector<1x32xf32>
    %81 = vector.broadcast %80 : vector<1x32xf32> to vector<8x32xf32>
    %82 = arith.addf %79, %81 : vector<8x32xf32>
    %83 = arith.addf %82, %3 : vector<8x32xf32>
    %c0_32 = arith.constant 0 : index
    %c0_33 = arith.constant 0 : index
    %84 = vector.load %arg9[%c0_32, %c0_33] : memref<1x32xf32, #tpu.memory_space<vmem>>, vector<1x32xf32>
    %c0_34 = arith.constant 0 : index
    %c0_35 = arith.constant 0 : index
    %85 = vector.load %arg10[%c0_34, %c0_35] : memref<1x32xf32, #tpu.memory_space<vmem>>, vector<1x32xf32>
    %cst_36 = arith.constant dense<0.000000e+00> : vector<8xf32>
    %86 = vector.multi_reduction <add>, %83, %cst_36 [1] : vector<8x32xf32> to vector<8xf32>
    %87 = vector.shape_cast %86 : vector<8xf32> to vector<8x1xf32>
    %cst_37 = arith.constant 3.200000e+01 : f32
    %88 = vector.broadcast %cst_37 : f32 to vector<8x1xf32>
    %89 = arith.divf %87, %88 : vector<8x1xf32>
    %90 = vector.broadcast %89 : vector<8x1xf32> to vector<8x32xf32>
    %91 = arith.subf %83, %90 : vector<8x32xf32>
    %92 = arith.mulf %91, %91 : vector<8x32xf32>
    %cst_38 = arith.constant dense<0.000000e+00> : vector<8xf32>
    %93 = vector.multi_reduction <add>, %92, %cst_38 [1] : vector<8x32xf32> to vector<8xf32>
    %94 = vector.shape_cast %93 : vector<8xf32> to vector<8x1xf32>
    %cst_39 = arith.constant 3.200000e+01 : f32
    %95 = vector.broadcast %cst_39 : f32 to vector<8x1xf32>
    %96 = arith.divf %94, %95 : vector<8x1xf32>
    %97 = vector.broadcast %89 : vector<8x1xf32> to vector<8x32xf32>
    %98 = arith.subf %83, %97 : vector<8x32xf32>
    %cst_40 = arith.constant 9.99999974E-6 : f32
    %99 = vector.broadcast %cst_40 : f32 to vector<8x1xf32>
    %100 = arith.addf %96, %99 : vector<8x1xf32>
    %101 = math.rsqrt %100 : vector<8x1xf32>
    %102 = vector.broadcast %101 : vector<8x1xf32> to vector<8x32xf32>
    %103 = arith.mulf %98, %102 : vector<8x32xf32>
    %104 = vector.broadcast %84 : vector<1x32xf32> to vector<8x32xf32>
    %105 = arith.mulf %104, %103 : vector<8x32xf32>
    %106 = vector.broadcast %85 : vector<1x32xf32> to vector<8x32xf32>
    %107 = arith.addf %105, %106 : vector<8x32xf32>
    %c0_41 = arith.constant 0 : index
    %c0_42 = arith.constant 0 : index
    %108 = vector.load %arg11[%c0_41, %c0_42] : memref<32x64xf32, #tpu.memory_space<vmem>>, vector<32x64xf32>
    %cst_43 = arith.constant dense<0.000000e+00> : vector<8x64xf32>
    %109 = tpu.matmul %1, %108, %cst_43 {dimension_numbers = #tpu.dot_dimension_numbers<[1], [0], [0], [1], [0, 0, 1, 1], [], []>} : vector<8x32xf32>, vector<32x64xf32>, vector<8x64xf32> -> vector<8x64xf32>
    %c0_44 = arith.constant 0 : index
    %c0_45 = arith.constant 0 : index
    %110 = vector.load %arg12[%c0_44, %c0_45] : memref<1x64xf32, #tpu.memory_space<vmem>>, vector<1x64xf32>
    %111 = vector.broadcast %110 : vector<1x64xf32> to vector<8x64xf32>
    %112 = arith.addf %109, %111 : vector<8x64xf32>
    %113 = vector.extract_strided_slice %112 {offsets = [0, 0], sizes = [8, 32], strides = [1, 1]} : vector<8x64xf32> to vector<8x32xf32>
    %114 = vector.extract_strided_slice %112 {offsets = [0, 32], sizes = [8, 32], strides = [1, 1]} : vector<8x64xf32> to vector<8x32xf32>
    %c0_46 = arith.constant 0 : index
    %c0_47 = arith.constant 0 : index
    %115 = vector.load %arg13[%c0_46, %c0_47] : memref<32x32xf32, #tpu.memory_space<vmem>>, vector<32x32xf32>
    %cst_48 = arith.constant dense<0.000000e+00> : vector<8x32xf32>
    %116 = tpu.matmul %107, %115, %cst_48 {dimension_numbers = #tpu.dot_dimension_numbers<[1], [0], [0], [1], [0, 0, 1, 1], [], []>} : vector<8x32xf32>, vector<32x32xf32>, vector<8x32xf32> -> vector<8x32xf32>
    %c0_49 = arith.constant 0 : index
    %c0_50 = arith.constant 0 : index
    %117 = vector.load %arg14[%c0_49, %c0_50] : memref<1x32xf32, #tpu.memory_space<vmem>>, vector<1x32xf32>
    %118 = vector.broadcast %117 : vector<1x32xf32> to vector<8x32xf32>
    %119 = arith.addf %116, %118 : vector<8x32xf32>
    %c0_51 = arith.constant 0 : index
    %c0_52 = arith.constant 0 : index
    %120 = vector.load %arg4[%c0_51, %c0_52] : memref<8x8xf32, #tpu.memory_space<vmem>>, vector<8x8xf32>
    %121 = vector.extract_strided_slice %119 {offsets = [0, 0], sizes = [8, 8], strides = [1, 1]} : vector<8x32xf32> to vector<8x8xf32>
    %122 = vector.extract_strided_slice %113 {offsets = [0, 0], sizes = [8, 8], strides = [1, 1]} : vector<8x32xf32> to vector<8x8xf32>
    %123 = vector.extract_strided_slice %114 {offsets = [0, 0], sizes = [8, 8], strides = [1, 1]} : vector<8x32xf32> to vector<8x8xf32>
    %cst_53 = arith.constant dense<0.000000e+00> : vector<8x8xf32>
    %124 = tpu.matmul %121, %122, %cst_53 {dimension_numbers = #tpu.dot_dimension_numbers<[1], [1], [0], [0], [0, 0, 1, 0], [], []>} : vector<8x8xf32>, vector<8x8xf32>, vector<8x8xf32> -> vector<8x8xf32>
    %125 = arith.addf %124, %120 : vector<8x8xf32>
    %cst_54 = arith.constant dense<0xFF800000> : vector<8xf32>
    %126 = vector.multi_reduction <maximumf>, %125, %cst_54 [1] : vector<8x8xf32> to vector<8xf32>
    %127 = vector.shape_cast %126 : vector<8xf32> to vector<8x1xf32>
    %128 = vector.broadcast %127 : vector<8x1xf32> to vector<8x8xf32>
    %129 = arith.subf %125, %128 : vector<8x8xf32>
    %130 = math.exp %129 : vector<8x8xf32>
    %cst_55 = arith.constant dense<0.000000e+00> : vector<8xf32>
    %131 = vector.multi_reduction <add>, %130, %cst_55 [1] : vector<8x8xf32> to vector<8xf32>
    %132 = vector.shape_cast %131 : vector<8xf32> to vector<8x1xf32>
    %133 = tpu.reciprocal %132 {approx = true} : vector<8x1xf32> -> vector<8x1xf32>
    %134 = vector.broadcast %133 : vector<8x1xf32> to vector<8x8xf32>
    %135 = arith.mulf %130, %134 : vector<8x8xf32>
    %cst_56 = arith.constant dense<0.000000e+00> : vector<8x8xf32>
    %136 = tpu.matmul %135, %123, %cst_56 {dimension_numbers = #tpu.dot_dimension_numbers<[1], [0], [0], [1], [0, 0, 1, 1], [], []>} : vector<8x8xf32>, vector<8x8xf32>, vector<8x8xf32> -> vector<8x8xf32>
    %137 = vector.extract_strided_slice %119 {offsets = [0, 8], sizes = [8, 8], strides = [1, 1]} : vector<8x32xf32> to vector<8x8xf32>
    %138 = vector.extract_strided_slice %113 {offsets = [0, 8], sizes = [8, 8], strides = [1, 1]} : vector<8x32xf32> to vector<8x8xf32>
    %139 = vector.extract_strided_slice %114 {offsets = [0, 8], sizes = [8, 8], strides = [1, 1]} : vector<8x32xf32> to vector<8x8xf32>
    %cst_57 = arith.constant dense<0.000000e+00> : vector<8x8xf32>
    %140 = tpu.matmul %137, %138, %cst_57 {dimension_numbers = #tpu.dot_dimension_numbers<[1], [1], [0], [0], [0, 0, 1, 0], [], []>} : vector<8x8xf32>, vector<8x8xf32>, vector<8x8xf32> -> vector<8x8xf32>
    %141 = arith.addf %140, %120 : vector<8x8xf32>
    %cst_58 = arith.constant dense<0xFF800000> : vector<8xf32>
    %142 = vector.multi_reduction <maximumf>, %141, %cst_58 [1] : vector<8x8xf32> to vector<8xf32>
    %143 = vector.shape_cast %142 : vector<8xf32> to vector<8x1xf32>
    %144 = vector.broadcast %143 : vector<8x1xf32> to vector<8x8xf32>
    %145 = arith.subf %141, %144 : vector<8x8xf32>
    %146 = math.exp %145 : vector<8x8xf32>
    %cst_59 = arith.constant dense<0.000000e+00> : vector<8xf32>
    %147 = vector.multi_reduction <add>, %146, %cst_59 [1] : vector<8x8xf32> to vector<8xf32>
    %148 = vector.shape_cast %147 : vector<8xf32> to vector<8x1xf32>
    %149 = tpu.reciprocal %148 {approx = true} : vector<8x1xf32> -> vector<8x1xf32>
    %150 = vector.broadcast %149 : vector<8x1xf32> to vector<8x8xf32>
    %151 = arith.mulf %146, %150 : vector<8x8xf32>
    %cst_60 = arith.constant dense<0.000000e+00> : vector<8x8xf32>
    %152 = tpu.matmul %151, %139, %cst_60 {dimension_numbers = #tpu.dot_dimension_numbers<[1], [0], [0], [1], [0, 0, 1, 1], [], []>} : vector<8x8xf32>, vector<8x8xf32>, vector<8x8xf32> -> vector<8x8xf32>
    %153 = vector.extract_strided_slice %119 {offsets = [0, 16], sizes = [8, 8], strides = [1, 1]} : vector<8x32xf32> to vector<8x8xf32>
    %154 = vector.extract_strided_slice %113 {offsets = [0, 16], sizes = [8, 8], strides = [1, 1]} : vector<8x32xf32> to vector<8x8xf32>
    %155 = vector.extract_strided_slice %114 {offsets = [0, 16], sizes = [8, 8], strides = [1, 1]} : vector<8x32xf32> to vector<8x8xf32>
    %cst_61 = arith.constant dense<0.000000e+00> : vector<8x8xf32>
    %156 = tpu.matmul %153, %154, %cst_61 {dimension_numbers = #tpu.dot_dimension_numbers<[1], [1], [0], [0], [0, 0, 1, 0], [], []>} : vector<8x8xf32>, vector<8x8xf32>, vector<8x8xf32> -> vector<8x8xf32>
    %157 = arith.addf %156, %120 : vector<8x8xf32>
    %cst_62 = arith.constant dense<0xFF800000> : vector<8xf32>
    %158 = vector.multi_reduction <maximumf>, %157, %cst_62 [1] : vector<8x8xf32> to vector<8xf32>
    %159 = vector.shape_cast %158 : vector<8xf32> to vector<8x1xf32>
    %160 = vector.broadcast %159 : vector<8x1xf32> to vector<8x8xf32>
    %161 = arith.subf %157, %160 : vector<8x8xf32>
    %162 = math.exp %161 : vector<8x8xf32>
    %cst_63 = arith.constant dense<0.000000e+00> : vector<8xf32>
    %163 = vector.multi_reduction <add>, %162, %cst_63 [1] : vector<8x8xf32> to vector<8xf32>
    %164 = vector.shape_cast %163 : vector<8xf32> to vector<8x1xf32>
    %165 = tpu.reciprocal %164 {approx = true} : vector<8x1xf32> -> vector<8x1xf32>
    %166 = vector.broadcast %165 : vector<8x1xf32> to vector<8x8xf32>
    %167 = arith.mulf %162, %166 : vector<8x8xf32>
    %cst_64 = arith.constant dense<0.000000e+00> : vector<8x8xf32>
    %168 = tpu.matmul %167, %155, %cst_64 {dimension_numbers = #tpu.dot_dimension_numbers<[1], [0], [0], [1], [0, 0, 1, 1], [], []>} : vector<8x8xf32>, vector<8x8xf32>, vector<8x8xf32> -> vector<8x8xf32>
    %169 = vector.extract_strided_slice %119 {offsets = [0, 24], sizes = [8, 8], strides = [1, 1]} : vector<8x32xf32> to vector<8x8xf32>
    %170 = vector.extract_strided_slice %113 {offsets = [0, 24], sizes = [8, 8], strides = [1, 1]} : vector<8x32xf32> to vector<8x8xf32>
    %171 = vector.extract_strided_slice %114 {offsets = [0, 24], sizes = [8, 8], strides = [1, 1]} : vector<8x32xf32> to vector<8x8xf32>
    %cst_65 = arith.constant dense<0.000000e+00> : vector<8x8xf32>
    %172 = tpu.matmul %169, %170, %cst_65 {dimension_numbers = #tpu.dot_dimension_numbers<[1], [1], [0], [0], [0, 0, 1, 0], [], []>} : vector<8x8xf32>, vector<8x8xf32>, vector<8x8xf32> -> vector<8x8xf32>
    %173 = arith.addf %172, %120 : vector<8x8xf32>
    %cst_66 = arith.constant dense<0xFF800000> : vector<8xf32>
    %174 = vector.multi_reduction <maximumf>, %173, %cst_66 [1] : vector<8x8xf32> to vector<8xf32>
    %175 = vector.shape_cast %174 : vector<8xf32> to vector<8x1xf32>
    %176 = vector.broadcast %175 : vector<8x1xf32> to vector<8x8xf32>
    %177 = arith.subf %173, %176 : vector<8x8xf32>
    %178 = math.exp %177 : vector<8x8xf32>
    %cst_67 = arith.constant dense<0.000000e+00> : vector<8xf32>
    %179 = vector.multi_reduction <add>, %178, %cst_67 [1] : vector<8x8xf32> to vector<8xf32>
    %180 = vector.shape_cast %179 : vector<8xf32> to vector<8x1xf32>
    %181 = tpu.reciprocal %180 {approx = true} : vector<8x1xf32> -> vector<8x1xf32>
    %182 = vector.broadcast %181 : vector<8x1xf32> to vector<8x8xf32>
    %183 = arith.mulf %178, %182 : vector<8x8xf32>
    %cst_68 = arith.constant dense<0.000000e+00> : vector<8x8xf32>
    %184 = tpu.matmul %183, %171, %cst_68 {dimension_numbers = #tpu.dot_dimension_numbers<[1], [0], [0], [1], [0, 0, 1, 1], [], []>} : vector<8x8xf32>, vector<8x8xf32>, vector<8x8xf32> -> vector<8x8xf32>
    %185 = tpu.concatenate %136, %152, %168, %184 in 1 : vector<8x8xf32>, vector<8x8xf32>, vector<8x8xf32>, vector<8x8xf32> -> vector<8x32xf32>
    %c0_69 = arith.constant 0 : index
    %c0_70 = arith.constant 0 : index
    %186 = vector.load %arg15[%c0_69, %c0_70] : memref<32x32xf32, #tpu.memory_space<vmem>>, vector<32x32xf32>
    %cst_71 = arith.constant dense<0.000000e+00> : vector<8x32xf32>
    %187 = tpu.matmul %185, %186, %cst_71 {dimension_numbers = #tpu.dot_dimension_numbers<[1], [0], [0], [1], [0, 0, 1, 1], [], []>} : vector<8x32xf32>, vector<32x32xf32>, vector<8x32xf32> -> vector<8x32xf32>
    %c0_72 = arith.constant 0 : index
    %c0_73 = arith.constant 0 : index
    %188 = vector.load %arg16[%c0_72, %c0_73] : memref<1x32xf32, #tpu.memory_space<vmem>>, vector<1x32xf32>
    %189 = vector.broadcast %188 : vector<1x32xf32> to vector<8x32xf32>
    %190 = arith.addf %187, %189 : vector<8x32xf32>
    %191 = arith.addf %190, %107 : vector<8x32xf32>
    %c0_74 = arith.constant 0 : index
    %c0_75 = arith.constant 0 : index
    %192 = vector.load %arg17[%c0_74, %c0_75] : memref<1x32xf32, #tpu.memory_space<vmem>>, vector<1x32xf32>
    %c0_76 = arith.constant 0 : index
    %c0_77 = arith.constant 0 : index
    %193 = vector.load %arg18[%c0_76, %c0_77] : memref<1x32xf32, #tpu.memory_space<vmem>>, vector<1x32xf32>
    %cst_78 = arith.constant dense<0.000000e+00> : vector<8xf32>
    %194 = vector.multi_reduction <add>, %191, %cst_78 [1] : vector<8x32xf32> to vector<8xf32>
    %195 = vector.shape_cast %194 : vector<8xf32> to vector<8x1xf32>
    %cst_79 = arith.constant 3.200000e+01 : f32
    %196 = vector.broadcast %cst_79 : f32 to vector<8x1xf32>
    %197 = arith.divf %195, %196 : vector<8x1xf32>
    %198 = vector.broadcast %197 : vector<8x1xf32> to vector<8x32xf32>
    %199 = arith.subf %191, %198 : vector<8x32xf32>
    %200 = arith.mulf %199, %199 : vector<8x32xf32>
    %cst_80 = arith.constant dense<0.000000e+00> : vector<8xf32>
    %201 = vector.multi_reduction <add>, %200, %cst_80 [1] : vector<8x32xf32> to vector<8xf32>
    %202 = vector.shape_cast %201 : vector<8xf32> to vector<8x1xf32>
    %cst_81 = arith.constant 3.200000e+01 : f32
    %203 = vector.broadcast %cst_81 : f32 to vector<8x1xf32>
    %204 = arith.divf %202, %203 : vector<8x1xf32>
    %205 = vector.broadcast %197 : vector<8x1xf32> to vector<8x32xf32>
    %206 = arith.subf %191, %205 : vector<8x32xf32>
    %cst_82 = arith.constant 9.99999974E-6 : f32
    %207 = vector.broadcast %cst_82 : f32 to vector<8x1xf32>
    %208 = arith.addf %204, %207 : vector<8x1xf32>
    %209 = math.rsqrt %208 : vector<8x1xf32>
    %210 = vector.broadcast %209 : vector<8x1xf32> to vector<8x32xf32>
    %211 = arith.mulf %206, %210 : vector<8x32xf32>
    %212 = vector.broadcast %192 : vector<1x32xf32> to vector<8x32xf32>
    %213 = arith.mulf %212, %211 : vector<8x32xf32>
    %214 = vector.broadcast %193 : vector<1x32xf32> to vector<8x32xf32>
    %215 = arith.addf %213, %214 : vector<8x32xf32>
    %c0_83 = arith.constant 0 : index
    %c0_84 = arith.constant 0 : index
    %216 = vector.load %arg19[%c0_83, %c0_84] : memref<32x64xf32, #tpu.memory_space<vmem>>, vector<32x64xf32>
    %cst_85 = arith.constant dense<0.000000e+00> : vector<8x64xf32>
    %217 = tpu.matmul %215, %216, %cst_85 {dimension_numbers = #tpu.dot_dimension_numbers<[1], [0], [0], [1], [0, 0, 1, 1], [], []>} : vector<8x32xf32>, vector<32x64xf32>, vector<8x64xf32> -> vector<8x64xf32>
    %c0_86 = arith.constant 0 : index
    %c0_87 = arith.constant 0 : index
    %218 = vector.load %arg20[%c0_86, %c0_87] : memref<1x64xf32, #tpu.memory_space<vmem>>, vector<1x64xf32>
    %219 = vector.broadcast %218 : vector<1x64xf32> to vector<8x64xf32>
    %220 = arith.addf %217, %219 : vector<8x64xf32>
    %cst_88 = arith.constant 0.000000e+00 : f32
    %221 = vector.broadcast %cst_88 : f32 to vector<8x64xf32>
    %222 = arith.maximumf %220, %221 : vector<8x64xf32>
    %c0_89 = arith.constant 0 : index
    %c0_90 = arith.constant 0 : index
    %223 = vector.load %arg21[%c0_89, %c0_90] : memref<64x32xf32, #tpu.memory_space<vmem>>, vector<64x32xf32>
    %cst_91 = arith.constant dense<0.000000e+00> : vector<8x32xf32>
    %224 = tpu.matmul %222, %223, %cst_91 {dimension_numbers = #tpu.dot_dimension_numbers<[1], [0], [0], [1], [0, 0, 1, 1], [], []>} : vector<8x64xf32>, vector<64x32xf32>, vector<8x32xf32> -> vector<8x32xf32>
    %c0_92 = arith.constant 0 : index
    %c0_93 = arith.constant 0 : index
    %225 = vector.load %arg22[%c0_92, %c0_93] : memref<1x32xf32, #tpu.memory_space<vmem>>, vector<1x32xf32>
    %226 = vector.broadcast %225 : vector<1x32xf32> to vector<8x32xf32>
    %227 = arith.addf %224, %226 : vector<8x32xf32>
    %228 = arith.addf %227, %215 : vector<8x32xf32>
    %c0_94 = arith.constant 0 : index
    %c0_95 = arith.constant 0 : index
    %229 = vector.load %arg23[%c0_94, %c0_95] : memref<1x32xf32, #tpu.memory_space<vmem>>, vector<1x32xf32>
    %c0_96 = arith.constant 0 : index
    %c0_97 = arith.constant 0 : index
    %230 = vector.load %arg24[%c0_96, %c0_97] : memref<1x32xf32, #tpu.memory_space<vmem>>, vector<1x32xf32>
    %cst_98 = arith.constant dense<0.000000e+00> : vector<8xf32>
    %231 = vector.multi_reduction <add>, %228, %cst_98 [1] : vector<8x32xf32> to vector<8xf32>
    %232 = vector.shape_cast %231 : vector<8xf32> to vector<8x1xf32>
    %cst_99 = arith.constant 3.200000e+01 : f32
    %233 = vector.broadcast %cst_99 : f32 to vector<8x1xf32>
    %234 = arith.divf %232, %233 : vector<8x1xf32>
    %235 = vector.broadcast %234 : vector<8x1xf32> to vector<8x32xf32>
    %236 = arith.subf %228, %235 : vector<8x32xf32>
    %237 = arith.mulf %236, %236 : vector<8x32xf32>
    %cst_100 = arith.constant dense<0.000000e+00> : vector<8xf32>
    %238 = vector.multi_reduction <add>, %237, %cst_100 [1] : vector<8x32xf32> to vector<8xf32>
    %239 = vector.shape_cast %238 : vector<8xf32> to vector<8x1xf32>
    %cst_101 = arith.constant 3.200000e+01 : f32
    %240 = vector.broadcast %cst_101 : f32 to vector<8x1xf32>
    %241 = arith.divf %239, %240 : vector<8x1xf32>
    %242 = vector.broadcast %234 : vector<8x1xf32> to vector<8x32xf32>
    %243 = arith.subf %228, %242 : vector<8x32xf32>
    %cst_102 = arith.constant 9.99999974E-6 : f32
    %244 = vector.broadcast %cst_102 : f32 to vector<8x1xf32>
    %245 = arith.addf %241, %244 : vector<8x1xf32>
    %246 = math.rsqrt %245 : vector<8x1xf32>
    %247 = vector.broadcast %246 : vector<8x1xf32> to vector<8x32xf32>
    %248 = arith.mulf %243, %247 : vector<8x32xf32>
    %249 = vector.broadcast %229 : vector<1x32xf32> to vector<8x32xf32>
    %250 = arith.mulf %249, %248 : vector<8x32xf32>
    %251 = vector.broadcast %230 : vector<1x32xf32> to vector<8x32xf32>
    %252 = arith.addf %250, %251 : vector<8x32xf32>
    %c0_103 = arith.constant 0 : index
    %c0_104 = arith.constant 0 : index
    %c0_105 = arith.constant 0 : index
    %253 = vector.load %arg25[%c0_103, %c0_104, %c0_105] : memref<1x8x32xf32, #tpu.memory_space<vmem>>, vector<1x8x32xf32>
    %254 = vector.shape_cast %253 : vector<1x8x32xf32> to vector<8x32xf32>
    %255 = vector.shape_cast %252 : vector<8x32xf32> to vector<1x8x32xf32>
    tpu.vector_store %arg25[%c0_103, %c0_104, %c0_105], %255 {strides = array<i32>} : memref<1x8x32xf32, #tpu.memory_space<vmem>>, vector<1x8x32xf32>,
    return
  }
  func.func @transform_0(%arg0: i32) -> (i32, i32, i32) {
    %c0_i32 = arith.constant 0 : i32
    %c0_i32_0 = arith.constant 0 : i32
    %c0_i32_1 = arith.constant 0 : i32
    return %arg0, %c0_i32, %c0_i32_0 : i32, i32, i32
  }
  func.func @transform_1(%arg0: i32) -> (i32, i32, i32) {
    %c0_i32 = arith.constant 0 : i32
    %c0_i32_0 = arith.constant 0 : i32
    %c0_i32_1 = arith.constant 0 : i32
    return %arg0, %c0_i32, %c0_i32_0 : i32, i32, i32
  }
  func.func @transform_2(%arg0: i32) -> (i32, i32) {
    %c0_i32 = arith.constant 0 : i32
    %c0_i32_0 = arith.constant 0 : i32
    %c0_i32_1 = arith.constant 0 : i32
    return %c0_i32, %c0_i32_0 : i32, i32
  }
  func.func @transform_3(%arg0: i32) -> (i32, i32) {
    %c0_i32 = arith.constant 0 : i32
    %c0_i32_0 = arith.constant 0 : i32
    %c0_i32_1 = arith.constant 0 : i32
    return %c0_i32, %c0_i32_0 : i32, i32
  }
  func.func @transform_4(%arg0: i32) -> (i32, i32) {
    %c0_i32 = arith.constant 0 : i32
    %c0_i32_0 = arith.constant 0 : i32
    %c0_i32_1 = arith.constant 0 : i32
    return %c0_i32, %c0_i32_0 : i32, i32
  }
  func.func @transform_5(%arg0: i32) -> (i32, i32) {
    %c0_i32 = arith.constant 0 : i32
    %c0_i32_0 = arith.constant 0 : i32
    %c0_i32_1 = arith.constant 0 : i32
    return %c0_i32, %c0_i32_0 : i32, i32
  }
  func.func @transform_6(%arg0: i32) -> (i32, i32) {
    %c0_i32 = arith.constant 0 : i32
    %c0_i32_0 = arith.constant 0 : i32
    %c0_i32_1 = arith.constant 0 : i32
    return %c0_i32, %c0_i32_0 : i32, i32
  }
  func.func @transform_7(%arg0: i32) -> (i32, i32) {
    %c0_i32 = arith.constant 0 : i32
    %c0_i32_0 = arith.constant 0 : i32
    %c0_i32_1 = arith.constant 0 : i32
    return %c0_i32, %c0_i32_0 : i32, i32
  }
  func.func @transform_8(%arg0: i32) -> (i32, i32) {
    %c0_i32 = arith.constant 0 : i32
    %c0_i32_0 = arith.constant 0 : i32
    %c0_i32_1 = arith.constant 0 : i32
    return %c0_i32, %c0_i32_0 : i32, i32
  }
  func.func @transform_9(%arg0: i32) -> (i32, i32) {
    %c0_i32 = arith.constant 0 : i32
    %c0_i32_0 = arith.constant 0 : i32
    %c0_i32_1 = arith.constant 0 : i32
    return %c0_i32, %c0_i32_0 : i32, i32
  }
  func.func @transform_10(%arg0: i32) -> (i32, i32) {
    %c0_i32 = arith.constant 0 : i32
    %c0_i32_0 = arith.constant 0 : i32
    %c0_i32_1 = arith.constant 0 : i32
    return %c0_i32, %c0_i32_0 : i32, i32
  }
  func.func @transform_11(%arg0: i32) -> (i32, i32) {
    %c0_i32 = arith.constant 0 : i32
    %c0_i32_0 = arith.constant 0 : i32
    %c0_i32_1 = arith.constant 0 : i32
    return %c0_i32, %c0_i32_0 : i32, i32
  }
  func.func @transform_12(%arg0: i32) -> (i32, i32) {
    %c0_i32 = arith.constant 0 : i32
    %c0_i32_0 = arith.constant 0 : i32
    %c0_i32_1 = arith.constant 0 : i32
    return %c0_i32, %c0_i32_0 : i32, i32
  }
  func.func @transform_13(%arg0: i32) -> (i32, i32) {
    %c0_i32 = arith.constant 0 : i32
    %c0_i32_0 = arith.constant 0 : i32
    %c0_i32_1 = arith.constant 0 : i32
    return %c0_i32, %c0_i32_0 : i32, i32
  }
  func.func @transform_14(%arg0: i32) -> (i32, i32) {
    %c0_i32 = arith.constant 0 : i32
    %c0_i32_0 = arith.constant 0 : i32
    %c0_i32_1 = arith.constant 0 : i32
    return %c0_i32, %c0_i32_0 : i32, i32
  }
  func.func @transform_15(%arg0: i32) -> (i32, i32) {
    %c0_i32 = arith.constant 0 : i32
    %c0_i32_0 = arith.constant 0 : i32
    %c0_i32_1 = arith.constant 0 : i32
    return %c0_i32, %c0_i32_0 : i32, i32
  }
  func.func @transform_16(%arg0: i32) -> (i32, i32) {
    %c0_i32 = arith.constant 0 : i32
    %c0_i32_0 = arith.constant 0 : i32
    %c0_i32_1 = arith.constant 0 : i32
    return %c0_i32, %c0_i32_0 : i32, i32
  }
  func.func @transform_17(%arg0: i32) -> (i32, i32) {
    %c0_i32 = arith.constant 0 : i32
    %c0_i32_0 = arith.constant 0 : i32
    %c0_i32_1 = arith.constant 0 : i32
    return %c0_i32, %c0_i32_0 : i32, i32
  }
  func.func @transform_18(%arg0: i32) -> (i32, i32) {
    %c0_i32 = arith.constant 0 : i32
    %c0_i32_0 = arith.constant 0 : i32
    %c0_i32_1 = arith.constant 0 : i32
    return %c0_i32, %c0_i32_0 : i32, i32
  }
  func.func @transform_19(%arg0: i32) -> (i32, i32) {
    %c0_i32 = arith.constant 0 : i32
    %c0_i32_0 = arith.constant 0 : i32
    %c0_i32_1 = arith.constant 0 : i32
    return %c0_i32, %c0_i32_0 : i32, i32
  }
  func.func @transform_20(%arg0: i32) -> (i32, i32) {
    %c0_i32 = arith.constant 0 : i32
    %c0_i32_0 = arith.constant 0 : i32
    %c0_i32_1 = arith.constant 0 : i32
    return %c0_i32, %c0_i32_0 : i32, i32
  }
  func.func @transform_21(%arg0: i32) -> (i32, i32) {
    %c0_i32 = arith.constant 0 : i32
    %c0_i32_0 = arith.constant 0 : i32
    %c0_i32_1 = arith.constant 0 : i32
    return %c0_i32, %c0_i32_0 : i32, i32
  }
  func.func @transform_22(%arg0: i32) -> (i32, i32) {
    %c0_i32 = arith.constant 0 : i32
    %c0_i32_0 = arith.constant 0 : i32
    %c0_i32_1 = arith.constant 0 : i32
    return %c0_i32, %c0_i32_0 : i32, i32
  }
  func.func @transform_23(%arg0: i32) -> (i32, i32) {
    %c0_i32 = arith.constant 0 : i32
    %c0_i32_0 = arith.constant 0 : i32
    %c0_i32_1 = arith.constant 0 : i32
    return %c0_i32, %c0_i32_0 : i32, i32
  }
  func.func @transform_24(%arg0: i32) -> (i32, i32, i32) {
    %c0_i32 = arith.constant 0 : i32
    %c0_i32_0 = arith.constant 0 : i32
    %c0_i32_1 = arith.constant 0 : i32
    return %arg0, %c0_i32, %c0_i32_0 : i32, i32, i32
  }
}

</mosaic_0001>

<bundles_post_ra>
// kernel: tpu_custom_call.1
= control target key start
LH: loop header
LB: loop body
LE: loop exit
PB: predicated region body
PF: predicated region fallthrough
CT: control target
= control target key end

     0   :  { %s3009_s0 = inlined_call_operand.hbm [shape: f32[2,8,32], index: 0, kind: input, shape index: {}]   ;;  %s3010_s1 = inlined_call_operand.hbm [shape: f32[2,8,32], index: 1, kind: input, shape index: {}]   ;;  %s3011_s2 = inlined_call_operand.hbm [shape: f32[8,8], index: 2, kind: input, shape index: {}]   ;;  %s3012_s3 = inlined_call_operand.hbm [shape: f32[8,8], index: 3, kind: input, shape index: {}]   ;;  %s3013_s4 = inlined_call_operand.vmem [shape: f32[32,96], index: 4, kind: input, shape index: {}]   ;;  %s3014_s5 = inlined_call_operand.vmem [shape: f32[1,96], index: 5, kind: input, shape index: {}]   ;;  %s3015_s6 = inlined_call_operand.vmem [shape: f32[32,32], index: 6, kind: input, shape index: {}]   ;;  %s3016_s7 = inlined_call_operand.vmem [shape: f32[1,32], index: 7, kind: input, shape index: {}]   ;;  %s3017_s8 = inlined_call_operand.vmem [shape: f32[1,32], index: 8, kind: input, shape index: {}]   ;;  %s3018_s9 = inlined_call_operand.vmem [shape: f32[1,32], index: 9, kind: input, shape index: {}]   ;;  %s3019_s10 = inlined_call_operand.vmem [shape: f32[32,64], index: 10, kind: input, shape index: {}]   ;;  %s3020_s11 = inlined_call_operand.vmem [shape: f32[1,64], index: 11, kind: input, shape index: {}]   ;;  %s3021_s12 = inlined_call_operand.hbm [shape: f32[32,32], index: 12, kind: input, shape index: {}]   ;;  %s3022_s13 = inlined_call_operand.vmem [shape: f32[1,32], index: 13, kind: input, shape index: {}]   ;;  %s3023_s14 = inlined_call_operand.hbm [shape: f32[32,32], index: 14, kind: input, shape index: {}]   ;;  %s3024_s15 = inlined_call_operand.vmem [shape: f32[1,32], index: 15, kind: input, shape index: {}]   ;;  %s3025_s16 = inlined_call_operand.vmem [shape: f32[1,32], index: 16, kind: input, shape index: {}]   ;;  %s3026_s17 = inlined_call_operand.vmem [shape: f32[1,32], index: 17, kind: input, shape index: {}]   ;;  %s3027_s18 = inlined_call_operand.hbm [shape: f32[32,64], index: 18, kind: input, shape index: {}]   ;;  %s3028_s19 = inlined_call_operand.vmem [shape: f32[1,64], index: 19, kind: input, shape index: {}]   ;;  %s3029_s20 = inlined_call_operand.vmem [shape: f32[64,32], index: 20, kind: input, shape index: {}]   ;;  %s3030_s21 = inlined_call_operand.vmem [shape: f32[1,32], index: 21, kind: input, shape index: {}]   ;;  %s3031_s22 = inlined_call_operand.vmem [shape: f32[1,32], index: 22, kind: input, shape index: {}]   ;;  %s3032_s23 = inlined_call_operand.vmem [shape: f32[1,32], index: 23, kind: input, shape index: {}]   ;;  %s3033_s24 = inlined_call_operand.hbm [shape: f32[2,8,32], index: 24, kind: output, shape index: {}]  }
   0x1   :  { %3050 = sst [smem:[#allocation28_spill]] %s3009_s0 }
   0x2   :  { %3051 = sst [smem:[#allocation29_spill]] %s3010_s1 }
   0x3   :  { %3052 = sst [smem:[#allocation30_spill]] %s3011_s2 }
   0x4   :  { %3053 = sst [smem:[#allocation31_spill]] %s3012_s3 }
   0x5   :  { %3054 = sst [smem:[#allocation32_spill]] %s3013_s4 }
   0x6   :  { %3055 = sst [smem:[#allocation33_spill]] %s3014_s5 }
   0x7   :  { %3056 = sst [smem:[#allocation34_spill]] %s3015_s6 }
   0x8   :  { %3057 = sst [smem:[#allocation35_spill]] %s3016_s7 }
   0x9   :  { %3058 = sst [smem:[#allocation36_spill]] %s3017_s8 }
   0xa   :  { %3059 = sst [smem:[#allocation37_spill]] %s3021_s12 }
   0xb   :  { %3060 = sst [smem:[#allocation38_spill]] %s3023_s14 }
   0xc   :  { %3061 = sst [smem:[#allocation39_spill]] %s3026_s17 }
   0xd   :  { %3062 = sst [smem:[#allocation40_spill]] %s3027_s18 }
   0xe   :  { %3063 = sst [smem:[#allocation41_spill]] %s3028_s19 }
   0xf   :  { %3064 = sst [smem:[#allocation42_spill]] %s3030_s21 }
  0x10   :  { %3065 = sst [smem:[#allocation43_spill]] %s3031_s22 }
  0x11   :  { %3066 = sst [smem:[#allocation44_spill]] %s3032_s23 }
  0x12   :  { %3067 = sst [smem:[#allocation45_spill]] %s3033_s24 }
  0x13   :  { %29 = vsyncpa [#allocation3], 0 }
  0x14   :  { %31 = vsyncpa [#allocation3 + $0x1], 0 }
  0x15   :  { %32 = vsyncpa [#allocation6], 0 }
  0x16   :  { %34 = vsyncpa [#allocation6 + $0x1], 0 }
  0x17   :  { %35 = vsyncpa [#allocation9], 0 }
  0x18   :  { %36 = vsyncpa [#allocation12], 0 }
  0x19   :  { %37 = vsyncpa [#allocation4], 0 }
  0x1a   :  { %39 = vsyncpa [#allocation4 + $0x1], 0  ;;  %s2582_s5 = smov 0   ;;  %s2584_s26 = smov 0  }
  0x1b   :  { %s2586_s27 = smov 0   ;;  %s2588_s28 = smov 0  }
  0x1c LB: > { %3068 = sst [smem:[#allocation21_spill]] %s2421_s5  ;;  %s2606_s7 = sadd.s32 4294967295, %s2433_s28   ;;  %s2433_s28 = sphi %s2588_s28, %s3108_s28   ;;  %s2429_s27 = sphi %s2586_s27, %s3110_s27   ;;  %s2425_s26 = sphi %s2584_s26, %s3112_s26   ;;  %s2421_s5 = sphi %s2582_s5, %s3111_s5  }
  0x1d   : > { %3069 = sst [smem:[#allocation22_spill]] %s2429_s27  ;;  %p1914_p0 = scmp.ge.s32.totalorder %s2433_s28, 1 }
  0x1e   : > { %3070 = sst [smem:[#allocation23_spill]] %s2433_s28  ;;  %p66_p1 = scmp.eq.s32.totalorder %s2606_s7, 0 }
  0x1f   : > { %s3071_s29 = sld [smem:[#allocation30_spill]]  ;;  %p590_p2 = scmp.lt.s32.totalorder %s2433_s28, 3 }
  0x20   : > { %s2435_s3 = smov [#allocation7]   ;;  %s3073_s1 = sld [smem:[#allocation31_spill]] }
  0x21   : > { %p2611_p3 = pnand %p1914_p0, %p590_p2  ;;  %s604_s25 = sshll.u32 %s2435_s3, 4  ;;  %s605_s25 = int_to_ptr.vmem [resolvable:$true] %s604_s25 }
  0x22   : > { %s3075_s14 = sld [smem:[#allocation38_spill]]  ;;  %s2437_s4 = smov [#allocation11]  }
  0x23   : > { %p1995_p5 = pneg %p2611_p3  ;;  %s3076_s12 = sld [smem:[#allocation37_spill]] }
  0x24   : > { %s2438_s19 = smov 128   ;;  %s3077_s18 = sld [smem:[#allocation40_spill]] }
  0x25   : > { %s602_s0 = sshll.u32 %s3071_s29, 4  ;;  %p2623_p6 = pnand %p1995_p5, %p66_p1  ;;  %s603_s0 = int_to_ptr.hbm [resolvable:$true] %s602_s0 }
  0x26   : > { %s614_s6 = sshll.u32 %s3073_s1, 4  ;;  %s2436_s29 = smov [#allocation8]   ;;  %s615_s6 = int_to_ptr.hbm [resolvable:$true] %s614_s6 }
  0x27   : > { %s616_s23 = sshll.u32 %s2436_s29, 4  ;;  %s668_s1 = sshll.u32 %s2437_s4, 4  ;;  %s617_s23 = int_to_ptr.vmem [resolvable:$true] %s616_s23  ;;  %s669_s1 = int_to_ptr.vmem [resolvable:$true] %s668_s1 }
  0x28   : > { %1998 = dma.hbm_to_vmem [thread:$0]  (!%p2623_p6), %s603_s0, 128, %s605_s25, [#allocation6]  }
  0x29   : > { %2001 = dma.hbm_to_vmem [thread:$0]  (!%p2623_p6), %s615_s6, 128, %s617_s23, [#allocation9]  }
  0x2a   : > { %s666_s8 = sshll.u32 %s3075_s14, 4  ;;  %s649_s29 = sshll.u32 %s3076_s12, 4  ;;  %s667_s8 = int_to_ptr.hbm [resolvable:$true] %s666_s8  ;;  %s650_s29 = int_to_ptr.hbm [resolvable:$true] %s649_s29 }
  0x2b   : > { %s2439_s0 = smov 8   ;;  %s2440_s23 = smov [#allocation10]  }
  0x2c   : > { %2007 = dma.hbm_to_vmem [thread:$0]  (!%p2623_p6), %s667_s8, 512, %s669_s1, [#allocation12], %s2438_s19, %s2438_s19, %s2439_s0  }
  0x2d   : > { %s651_s24 = sshll.u32 %s2440_s23, 4  ;;  %s689_s21 = sshll.u32 %s3077_s18, 4  ;;  %s652_s24 = int_to_ptr.vmem [resolvable:$true] %s651_s24  ;;  %s690_s21 = int_to_ptr.hbm [resolvable:$true] %s689_s21 }
  0x2e   : > { %2004 = dma.hbm_to_vmem [thread:$0]  (!%p2623_p6), %s650_s29, 512, %s652_s24, [#allocation9], %s2438_s19, %s2438_s19, %s2439_s0  }
  0x2f   : > { %s2441_s22 = smov [#allocation13]   ;;  %s1913_s8 = sadd.s32 4294967294, %s2433_s28  }
  0x30   : > { %s691_s3 = sshll.u32 %s2441_s22, 4  ;;  %s2648_s4 = sadd.s32 1, %s2433_s28   ;;  %s692_s3 = int_to_ptr.vmem [resolvable:$true] %s691_s3 }
  0x31   : > { %2010 = dma.hbm_to_vmem [thread:$0]  (!%p2623_p6), %s690_s21, 512, %s692_s3, [#allocation12], %s2438_s19, %s2438_s19, %s2439_s0  }
  0x32   : > { %3078 = sst [smem:[#allocation24_spill]] %s2648_s4  ;;  %s52_s1 = sadd.s32 1, %s2429_s27 }
  0x33   : > { %s49_s23 = ssub.s32 %s2433_s28, %s2648_s4  ;;  %p59_p7 = scmp.ne.s32.totalorder %s2429_s27, %s2425_s26 }
  0x34   : > { %p50_p8 = scmp.eq.s32.totalorder %s49_s23, 0  ;;  %p60_p9 = scmp.eq.s32.totalorder %s2433_s28, 0 }
  0x35   : > { %p65_p10 = scmp.ne.s32.totalorder %s2425_s26, %s2421_s5  ;;  %p577_p11 = scmp.eq.s32.totalorder %s2606_s7, 1 }
  0x36   : > { %s2660_s29 = scalar_select %p50_p8, %s2429_s27, %s52_s1  }
  0x37   : > { %p2662_p12 = por %p60_p9, %p59_p7  ;;  %p2668_p13 = por %p66_p1, %p65_p10 }
  0x38   : > { %3079 = sst [smem:[#allocation25_spill]] %s2660_s29  ;;  %p2672_p0 = por %p577_p11, %p59_p7 }
  0x39   : > { %p583_p2 = scmp.eq.s32.totalorder %s1913_s8, 1  ;;  %p2027_p5 = scmp.lt.s32.totalorder %s2433_s28, 2 }
  0x3a   : > { %s3082_s2 = scalar_select %p2672_p0, 1, 0 }
  0x3b   : > { %s720_s0 = sand.u32 1, %s2429_s27   ;;  %p2678_p6 = por %p583_p2, %p65_p10 }
  0x3c   : > { %3083 = sst [smem:[#allocation26_spill]] %s3082_s2  ;;  %s1921_s6 = sshll.u32 %s720_s0, 3 }
  0x3d   : > { %s3084_s25 = scalar_select %p2678_p6, 1, 0 }
  0x3e   : > { %s1922_s21 = sshll.u32 %s2433_s28, 3  ;;  %s3086_s1 = sld [smem:[#allocation28_spill]] }
  0x3f   : > { %3085 = sst [smem:[#allocation27_spill]] %s3084_s25  ;;  %s724_s14 = scalar_lea.vmem [#allocation2], %s1921_s6 }
  0x40   : > { %s732_s18 = sshll.u32 %s724_s14, 4  ;;  %p2688_p7 = pnand %p2027_p5, %p2662_p12  ;;  %s733_s18 = int_to_ptr.vmem [resolvable:$true] %s732_s18 }
  0x41   : > { %s3088_s4 = sld [smem:[#allocation29_spill]]  ;;  %s739_s5 = sand.u32 1, %s2433_s28  }
  0x42   : > { %s721_s2 = scalar_lea.sflag [#allocation3], %s720_s0  ;;  %p2295_p9 = pneg %p2688_p7 }
  0x44   : > { %s728_s23 = scalar_lea.hbm %s3086_s1, %s1922_s21 }
  0x45   : > { %s730_s12 = sshll.u32 %s728_s23, 4  ;;  %s2298_s23 = scalar_lea.hbm %s3086_s1, 16  ;;  %s731_s12 = int_to_ptr.hbm [resolvable:$true] %s730_s12 }
  0x46   : > { %s2291_s22 = sshra.s32 %s731_s12, 4  ;;  %s2292_s22 = int_to_ptr.hbm [resolvable:$true] %s2291_s22 }
  0x47   : > { %s747_s25 = scalar_lea.hbm %s3088_s4, %s1922_s21  ;;  %s2293_s3 = scalar_lea.hbm %s2292_s22, 8 }
  0x48   : > { %p2294_p8 = scmp.ne.s32.totalorder %s2292_s22, %s2293_s3  ;;  %p2299_p12 = scmp.lt.s32.totalorder %s2292_s22, %s3086_s1 }
  0x49   : > { %p2300_p2 = scmp.lt.s32.totalorder %s2298_s23, %s2293_s3 }
  0x4a   : > { %p2296_p10 = pnand %p2295_p9, %p2294_p8 }
  0x4b   : > { %p2301_p5 = por %p2300_p2, %p2299_p12 }
  0x4c   : > { %p2297_p11 = pneg %p2296_p10 }
  0x4e   : > { %p2302_p4 = pnand %p2301_p5, %p2297_p11 }
  0x50   : > { %2305 = shalt.err (!%p2302_p4)
}
  0x51   : > { %2014 = dma.hbm_to_vmem [thread:$0]  (!%p2688_p7), %s731_s12, 128, %s733_s18, %s721_s2  }
  0x52   : > { %s749_s0 = sshll.u32 %s747_s25, 4  ;;  %s743_s21 = scalar_lea.vmem [#allocation5], %s1921_s6  ;;  %s750_s0 = int_to_ptr.hbm [resolvable:$true] %s749_s0 }
  0x53   : > { %s751_s28 = sshll.u32 %s743_s21, 4  ;;  %s740_s17 = scalar_lea.sflag [#allocation6], %s739_s5  ;;  %s752_s28 = int_to_ptr.vmem [resolvable:$true] %s751_s28 }
  0x54   : > { %s2321_s14 = sshra.s32 %s750_s0, 4  ;;  %s2328_s23 = scalar_lea.hbm %s3088_s4, 16  ;;  %s2322_s14 = int_to_ptr.hbm [resolvable:$true] %s2321_s14 }
  0x55   : > { %s2323_s24 = scalar_lea.hbm %s2322_s14, 8  ;;  %p2329_p4 = scmp.lt.s32.totalorder %s2322_s14, %s3088_s4 }
  0x56   : > { %p2324_p8 = scmp.ne.s32.totalorder %s2322_s14, %s2323_s24  ;;  %p2330_p11 = scmp.lt.s32.totalorder %s2328_s23, %s2323_s24 }
  0x58   : > { %p2326_p10 = pnand %p2324_p8, %p2295_p9  ;;  %p2331_p2 = por %p2330_p11, %p2329_p4 }
  0x5a   : > { %p2327_p12 = pneg %p2326_p10 }
  0x5c   : > { %p2332_p5 = pnand %p2331_p2, %p2327_p12 }
  0x5e   : > { %2335 = shalt.err (!%p2332_p5)
}
  0x5f   : > { %2017 = dma.hbm_to_vmem [thread:$0]  (!%p2688_p7), %s750_s0, 128, %s752_s28, %s740_s17  }
  0x60   : > { %760 = sbr.rel (%p2611_p3) target bundleno = 3282 (0xcd2), region = 116  ;;  %s2723_s18 = sand.u32 (!%p2611_p3), 1, %s2425_s26  }
  0x61   : > { %s2726_s5 = sshll.u32 (!%p2611_p3), %s2723_s18, 3  ;;  %s763_s2 = scalar_lea.sflag (!%p2611_p3), [#allocation3], %s2723_s18 }
  0x62   : > { %s766_s25 = scalar_lea.vmem (!%p2611_p3), [#allocation2], %s2726_s5 }
  0x65   : > { %2396 = dma.done.wait (%p2668_p13), %s763_s2, 128  }
  0x66   : > { %2398 = vsyncadd (%p2668_p13), %s763_s2, 4294967168  ;;  %s772_s17 = sand.u32 1, %s2606_s7   ;;  %s776_s30 = scalar_lea.vmem [#allocation5], %s2726_s5 }
  0x67   : > { %s773_s28 = scalar_lea.sflag [#allocation6], %s772_s17 }
  0x68   : > { %2400 = dma.done.wait (%p2668_p13), %s773_s28, 128  }
  0x69   : > { %2402 = vsyncadd (%p2668_p13), %s773_s28, 4294967168 }
  0x6a   : > { %2404 = dma.done.wait (%p66_p1), [#allocation6], 128  }
  0x6b   : > { %2406 = vsyncadd (%p66_p1), [#allocation6], 4294967168 }
  0x6c   : > { %2408 = dma.done.wait (%p66_p1), [#allocation9], 640  }
  0x6d   : > { %2410 = vsyncadd (%p66_p1), [#allocation9], 4294966656 }
  0x6e   : > { %2412 = dma.done.wait (%p66_p1), [#allocation12], 1024  }
  0x6f   : > { %2414 = vsyncadd (%p66_p1), [#allocation12], 4294966272  ;;  %s3089_s8 = sld [smem:[#allocation32_spill]]  ;;  %vm882_vm0 = vcmask 261120   ;;  %v2764_v4 = vld [vmem:[%s776_s30] sm:$0xff]  ;;  %s2442_s12 = smov 72  }
  0x70   : > { %s3090_s27 = sld [smem:[#allocation33_spill]]  ;;  %s2443_s2 = smov 120   ;;  %vm910_vm1 = vcmask 64512   ;;  %v906_v15 = vld [vmem:[#allocation7] sm:$0xff]  ;;  %vm1180_vm2 = vcmask 130048   ;;  %vm1182_vm3 = vcmask 195584  }
  0x71   : > { %s2444_s17 = smov 96   ;;  %s2445_s28 = smov 112   ;;  %vm1699_vm11 = vcmask 523264  }
  0x72   : > { %s2446_s30 = smov 80   ;;  %s3047_s19 = smov 88  }
  0x73   : > { %s2448_s6 = smov 104   ;;  %s2449_s29 = smov 64  }
  0x74   : > { %s2450_s0 = smov 40   ;;  %s2451_s21 = smov 56  }
  0x75   : > { %v877_v0 = vld [vmem:[%s3089_s8 + $0x18] sm:$0xff]  ;;  %v876_v1 = vld [vmem:[%s3089_s8 + $0x10] sm:$0xff]  ;;  %v875_v2 = vld [vmem:[%s3089_s8 + $0x8] sm:$0xff]  ;;  %s2452_s14 = smov 48   ;;  %s3049_s24 = smov 16  }
  0x76   : > { %898 = vmatpush.msra.mxu0 %v877_v0  ;;  %v874_v3 = vld [vmem:[%s3089_s8] sm:$0xff]  ;;  %s3048_s22 = smov 8   ;;  %s2455_s3 = smov 24  }
  0x77   : > { %v2088_v5 = vld [vmem:[%s3090_s27] ss:$0 sm:$0xff]  ;;  %s3092_s27 = sld [smem:[#allocation35_spill]]  ;;  %s1758_s23 = scalar_lea.sflag [#allocation4], %s2723_s18 }
  0x78   : > { %899 = vmatpush.msra.mxu0 %v876_v1 }
  0x7a   : > { %900 = vmatpush.msra.mxu0 %v875_v2 }
  0x7c   : > { %901 = vmatpush.msra.mxu0 %v874_v3 }
  0x7d   : > { %1934 = vmatmul.msk.f32.vlgmr.msra.gmra.mxu0 %vm882_vm0, %v2764_v4 }
  0xfa   : > { %v903_v6 = vpop.f32.mrf.mxu0 }
  0xfb   : > { %v2771_v7 = vadd.f32 %v2088_v5, %v903_v6 }
  0xfd   : > { %1104 = vrot.lane.b32.xlu2 %v2771_v7, %s2442_s12  ;;  %972 = vrot.lane.b32.xlu1 %v2771_v7, %s2443_s2 }
  0xfe   : > { %908 = vrot.lane.b32.xlu0 %v2771_v7, %s2444_s17 }
 0x105   : > { %1037 = vrot.lane.b32.xlu2 %v2771_v7, %s2445_s28  ;;  %1039 = vrot.lane.b32.xlu1 %v2771_v7, %s2446_s30 }
 0x106   : > { %974 = vrot.lane.b32.xlu0 %v2771_v7, %s3047_s19 }
 0x10e   : > { %1102 = vrot.lane.b32.xlu0 %v2771_v7, %s2448_s6 }
 0x157   : > { %v1105_v10 = vpop.permute.xlu2 %1104 }
 0x15f   : > { %v1038_v13 = vpop.permute.xlu2 %1037 }
 0x16f   : > { %v973_v8 = vpop.permute.xlu1 %972 }
 0x170   : > { %v909_v9 = vpop.permute.xlu0 %908 }
 0x171   : > { %1935 = vmatpush.xpose.msk.msra.mxu1 %vm910_vm1, %v909_v9 }
 0x174   : > { %1936 = vmatmul.msk.f32.vlgmr.msra.gmra.mxu1 %vm910_vm1, %v2771_v7 }
 0x177   : > { %v1040_v11 = vpop.permute.xlu1 %1039 }
 0x178   : > { %v975_v12 = vpop.permute.xlu0 %974  ;;  %1941 = vmatpush.xpose.msk.msrb.mxu1 %vm910_vm1, %v1040_v11 }
 0x179   : > { %1938 = vmatpush.xpose.msk.msrb.mxu0 %vm910_vm1, %v975_v12 }
 0x17c   : > { %1939 = vmatmul.msk.f32.vlgmr.msrb.gmra.mxu0 %vm910_vm1, %v973_v8  ;;  %1942 = vmatmul.msk.f32.vlgmr.msrb.gmra.mxu1 %vm910_vm1, %v1038_v13 }
 0x17d   : > { %1944 = vmatpush.xpose.msk.msra.mxu0 %vm910_vm1, %v1105_v10 }
 0x180   : > { %v1103_v14 = vpop.permute.xlu0 %1102 }
 0x184   : > { %1945 = vmatmul.msk.f32.vlgmr.msra.gmra.mxu0 %vm910_vm1, %v1103_v14 }
 0x1f1   : > { %v932_v16 = vpop.f32.mrf.mxu1 }
 0x1f2   : > { %v933_v17 = vadd.f32 %v932_v16, %v906_v15 }
 0x1f4   : > { %v935_v18 = vsel %vm910_vm1, %v933_v17, -inf }
 0x1f5   : > { %936 = vmax.xlane.f32.xlu1 %v935_v18 }
 0x1f9   : > { %v997_v19 = vpop.f32.mrf.mxu0  ;;  %v1062_v20 = vpop.f32.mrf.mxu1 }
 0x1fa   : > { %v998_v21 = vadd.f32 %v997_v19, %v906_v15  ;;  %v1063_v22 = vadd.f32 %v1062_v20, %v906_v15  ;;  %v2456_v20 = vmov 32.0  }
 0x1fc   : > { %v1065_v23 = vsel %vm910_vm1, %v1063_v22, -inf  ;;  %v1000_v24 = vsel %vm910_vm1, %v998_v21, -inf }
 0x1fd   : > { %1066 = vmax.xlane.f32.xlu0 %v1065_v23  ;;  %1001 = vmax.xlane.f32.xlu2 %v1000_v24  ;;  %v1256_v23 = vld [vmem:[%s3019_s10 + $0x8] sm:$0xff] }
 0x201   : > { %v1127_v25 = vpop.f32.mrf.mxu0 }
 0x202   : > { %v1128_v26 = vadd.f32 %v1127_v25, %v906_v15  ;;  %v2089_v15 = vld [vmem:[%s3092_s27] ss:$0 sm:$0xff]  ;;  %s3099_s27 = sld [smem:[#allocation42_spill]] }
 0x203   : > { %v872_v25 = vld [vmem:[%s766_s25] sm:$0xff] }
 0x204   : > { %v1130_v27 = vsel %vm910_vm1, %v1128_v26, -inf }
 0x205   : > { %1131 = vmax.xlane.f32.xlu2 %v1130_v27 }
 0x211   : > { %946 = vrot.lane.b32.xlu0 %v2771_v7, %s2449_s29  ;;  %s3091_s29 = sld [smem:[#allocation34_spill]] }
 0x217   : > { %v1187_v5 = vld [vmem:[%s3091_s29 + $0x18] sm:$0xff]  ;;  %v1186_v6 = vld [vmem:[%s3091_s29 + $0x10] sm:$0xff]  ;;  %v1184_v8 = vld [vmem:[%s3091_s29] sm:$0xff] }
 0x218   : > { %1207 = vmatpush.msra.mxu1 %v1187_v5 }
 0x219   : > { %1141 = vrot.lane.b32.xlu0 %v2771_v7, %s2450_s0 }
 0x21a   : > { %1208 = vmatpush.msra.mxu1 %v1186_v6 }
 0x268   : > { %v937_v28 = vpop.xlane.xlu1 %936 }
 0x269   : > { %v938_v29 = vsub.f32 %v933_v17, %v937_v28 }
 0x26b   : > { %v939_v30 = vmul.f32 1.442695, %v938_v29 }
 0x26d   : > { %2101 = vpow2.f32 %v939_v30 }
 0x270   : > { %v1002_v31 = vpop.xlane.xlu2 %1001  ;;  %v1067_v32 = vpop.xlane.xlu0 %1066 }
 0x271   : > { %v1003_v33 = vsub.f32 %v998_v21, %v1002_v31  ;;  %v1068_v34 = vsub.f32 %v1063_v22, %v1067_v32  ;;  %v1258_v21 = vld [vmem:[%s3019_s10 + $0x18] sm:$0xff]  ;;  %v1257_v22 = vld [vmem:[%s3019_s10 + $0x10] sm:$0xff] }
 0x273   : > { %v2102_v35 = vpop.eup %2101  ;;  %v1004_v36 = vmul.f32 1.442695, %v1003_v33  ;;  %v1069_v37 = vmul.f32 1.442695, %v1068_v34 }
 0x274   : > { %v941_v38 = vsel %vm910_vm1, %v2102_v35, 0.0 }
 0x275   : > { %2103 = vpow2.f32 %v1004_v36  ;;  %942 = vadd.xlane.f32.xlu1 %v941_v38  ;;  %v1289_v36 = vld [vmem:[#allocation10 + $0x18] sm:$0xff]  ;;  %v1287_v38 = vld [vmem:[#allocation10 + $0x8] sm:$0xff] }
 0x276   : > { %2105 = vpow2.f32 %v1069_v37  ;;  %1309 = vmatpush.msrb.mxu0 %v1289_v36  ;;  %v1288_v37 = vld [vmem:[#allocation10 + $0x10] sm:$0xff] }
 0x278   : > { %v1132_v39 = vpop.xlane.xlu2 %1131  ;;  %1310 = vmatpush.msrb.mxu0 %v1288_v37 }
 0x279   : > { %v1133_v40 = vsub.f32 %v1128_v26, %v1132_v39  ;;  %v1286_v39 = vld [vmem:[#allocation10] sm:$0xff] }
 0x27a   : > { %1311 = vmatpush.msrb.mxu0 %v1287_v38 }
 0x27b   : > { %v2104_v41 = vpop.eup %2103  ;;  %v1134_v42 = vmul.f32 1.442695, %v1133_v40  ;;  %v2092_v40 = vld [vmem:[%s3020_s11] ss:$0 sm:$0xff] }
 0x27c   : > { %v2106_v43 = vpop.eup %2105  ;;  %v1006_v44 = vsel %vm910_vm1, %v2104_v41, 0.0  ;;  %1312 = vmatpush.msrb.mxu0 %v1286_v39 }
 0x27d   : > { %2107 = vpow2.f32 %v1134_v42  ;;  %1007 = vadd.xlane.f32.xlu2 %v1006_v44  ;;  %v1071_v45 = vsel %vm910_vm1, %v2106_v43, 0.0 }
 0x27e   : > { %1072 = vadd.xlane.f32.xlu1 %v1071_v45 }
 0x283   : > { %v2108_v46 = vpop.eup %2107  ;;  %v947_v47 = vpop.permute.xlu0 %946 }
 0x284   : > { %967 = vmatpush.msra.mxu2 %v947_v47  ;;  %v1136_v48 = vsel %vm910_vm1, %v2108_v46, 0.0 }
 0x285   : > { %1137 = vadd.xlane.f32.xlu2 %v1136_v48 }
 0x28b   : > { %v1142_v61 = vpop.permute.xlu0 %1141 }
 0x297   : > { %1011 = vrot.lane.b32.xlu1 %v2771_v7, %s2451_s21  ;;  %s3093_s21 = sld [smem:[#allocation36_spill]] }
 0x29d   : > { %1076 = vrot.lane.b32.xlu2 %v2771_v7, %s2452_s14  ;;  %v1185_v7 = vld [vmem:[%s3091_s29 + $0x8] sm:$0xff]  ;;  %s3098_s14 = sld [smem:[#allocation41_spill]] }
 0x29e   : > { %1209 = vmatpush.msra.mxu1 %v1185_v7 }
 0x2a0   : > { %1210 = vmatpush.msra.mxu1 %v1184_v8 }
 0x2e8   : > { %v943_v49 = vpop.xlane.xlu1 %942 }
 0x2e9   : > { %2109 = vrcp.f32 %v943_v49 }
 0x2ef   : > { %v2110_v50 = vpop.eup %2109 }
 0x2f0   : > { %v1008_v51 = vpop.xlane.xlu2 %1007  ;;  %v945_v52 = vmul.f32 %v2110_v50, %v2102_v35 }
 0x2f1   : > { %v1073_v53 = vpop.xlane.xlu1 %1072 }
 0x2f2   : > { %1937 = vmatmul.msk.f32.vlgmr.msra.gmra.mxu2 %vm910_vm1, %v945_v52  ;;  %2111 = vrcp.f32 %v1073_v53  ;;  %v2090_v52 = vld [vmem:[%s3093_s21] ss:$0 sm:$0xff]  ;;  %s3103_s21 = sld [smem:[#allocation44_spill]] }
 0x2f3   : > { %2113 = vrcp.f32 %v1008_v51 }
 0x2f8   : > { %v1138_v54 = vpop.xlane.xlu2 %1137  ;;  %v2112_v55 = vpop.eup %2111 }
 0x2f9   : > { %v1075_v57 = vmul.f32 %v2112_v55, %v2106_v43  ;;  %v2114_v58 = vpop.eup %2113  ;;  %2115 = vrcp.f32 %v1138_v54  ;;  %v2091_v55 = vld [vmem:[%s3018_s9] ss:$0 sm:$0xff] }
 0x2fa   : > { %v1010_v60 = vmul.f32 %v2114_v58, %v2104_v41  ;;  %2117 = vrcp.f32 %v2456_v20 }
 0x2ff   : > { %v2116_v62 = vpop.eup %2115 }
 0x300   : > { %v1077_v56 = vpop.permute.xlu2 %1076  ;;  %v1140_v63 = vmul.f32 %v2116_v62, %v2108_v46  ;;  %v2118_v24 = vpop.eup %2117 }
 0x301   : > { %1097 = vmatpush.msra.mxu3 %v1077_v56  ;;  %v1222_v26 = vmul.f32 32.0, %v2118_v24  ;;  %vm1226_vm4 = vweird.f32 %v2118_v24 }
 0x302   : > { %1943 = vmatmul.msk.f32.vlgmr.msra.gmra.mxu3 %vm910_vm1, %v1075_v57 }
 0x303   : > { %1278 = vmatpush.msrb.mxu3 %v1258_v21  ;;  %v1223_v27 = vsub.f32 1.0, %v1222_v26 }
 0x305   : > { %1279 = vmatpush.msrb.mxu3 %v1257_v22  ;;  %v1224_v28 = vmul.f32 %v2118_v24, %v1223_v27 }
 0x307   : > { %1280 = vmatpush.msrb.mxu3 %v1256_v23  ;;  %v1225_v29 = vadd.f32 %v2118_v24, %v1224_v28 }
 0x309   : > { %v1012_v59 = vpop.permute.xlu1 %1011  ;;  %v2851_v30 = vsel %vm1226_vm4, %v2118_v24, %v1225_v29 }
 0x30a   : > { %1032 = vmatpush.msrb.mxu2 %v1012_v59 }
 0x30b   : > { %1940 = vmatmul.msk.f32.vlgmr.msrb.gmra.mxu2 %vm910_vm1, %v1010_v60  ;;  %v2093_v60 = vld [vmem:[%s3022_s13] ss:$0 sm:$0xff] }
 0x30c   : > { %1162 = vmatpush.msra.mxu2 %v1142_v61 }
 0x313   : > { %1946 = vmatmul.msk.f32.vlgmr.msra.gmra.mxu2 %vm910_vm1, %v1140_v63 }
 0x375   : > { %v969_v1 = vpop.f32.mrf.mxu2 }
 0x385   : > { %v1099_v0 = vpop.f32.mrf.mxu3 }
 0x386   : > { %1172 = vrot.lane.b32.xlu1 %v1099_v0, %s3049_s24 }
 0x38e   : > { %v1034_v2 = vpop.f32.mrf.mxu2 }
 0x38f   : > { %1168 = vrot.lane.b32.xlu0 %v1034_v2, %s3048_s22 }
 0x396   : > { %v1164_v3 = vpop.f32.mrf.mxu2 }
 0x397   : > { %1176 = vrot.lane.b32.xlu0 %v1164_v3, %s2455_s3  ;;  %v1317_v3 = vld [vmem:[#allocation8] sm:$0xff] }
 0x3f8   : > { %v1173_v11 = vpop.permute.xlu1 %1172 }
 0x401   : > { %v1169_v9 = vpop.permute.xlu0 %1168 }
 0x402   : > { %v1179_v10 = vsel %vm910_vm1, %v969_v1, %v1169_v9 }
 0x403   : > { %v1181_v12 = vsel %vm1180_vm2, %v1179_v10, %v1173_v11 }
 0x409   : > { %v1177_v13 = vpop.permute.xlu0 %1176 }
 0x40a   : > { %v1183_v14 = vsel %vm1182_vm3, %v1181_v12, %v1177_v13 }
 0x40b   : > { %1947 = vmatmul.msk.f32.vlgmr.msra.gmra.mxu1 %vm882_vm0, %v1183_v14 }
 0x488   : > { %v1212_v16 = vpop.f32.mrf.mxu1 }
 0x489   : > { %v1213_v17 = vadd.f32 %v2089_v15, %v1212_v16 }
 0x48b   : > { %v1215_v18 = vadd.f32 %v1213_v17, %v2764_v4  ;;  %v1255_v4 = vld [vmem:[%s3019_s10] sm:$0xff] }
 0x48c   : > { %1281 = vmatpush.msrb.mxu3 %v1255_v4 }
 0x48d   : > { %v1218_v19 = vsel %vm882_vm0, %v1215_v18, 0.0  ;;  %1948 = vmatmul.msk.f32.vlgmr.msrb.gmra.mxu3 %vm882_vm0, %v872_v25 }
 0x48e   : > { %1219 = vadd.xlane.f32.xlu2 %v1218_v19 }
 0x501   : > { %v1220_v31 = vpop.xlane.xlu2 %1219 }
 0x502   : > { %v1228_v32 = vmul.f32 %v2851_v30, %v1220_v31 }
 0x504   : > { %v1229_v33 = vsub.f32 %v1215_v18, %v1228_v32 }
 0x506   : > { %v1230_v34 = vmul.f32 %v1229_v33, %v1229_v33 }
 0x508   : > { %v1231_v35 = vsel %vm882_vm0, %v1230_v34, 0.0 }
 0x509   : > { %1232 = vadd.xlane.f32.xlu1 %v1231_v35 }
 0x510   : > { %v1283_v41 = vpop.f32.mrf.mxu3 }
 0x511   : > { %v2858_v42 = vadd.f32 %v2092_v40, %v1283_v41 }
 0x513   : > { %1383 = vrot.lane.b32.xlu0 %v2858_v42, %s2443_s2  ;;  %1950 = vmatpush.xpose.msk.msrb.mxu2 %vm910_vm1, %v2858_v42 }
 0x51b   : > { %1448 = vrot.lane.b32.xlu0 %v2858_v42, %s2445_s28 }
 0x523   : > { %1513 = vrot.lane.b32.xlu0 %v2858_v42, %s2448_s6 }
 0x57c   : > { %v1233_v43 = vpop.xlane.xlu1 %1232 }
 0x57d   : > { %v1234_v44 = vmul.f32 %v1233_v43, %v2851_v30 }
 0x57f   : > { %v1235_v45 = vadd.f32 1e-05, %v1234_v44 }
 0x581   : > { %2119 = vrsqrt.f32 %v1235_v45  ;;  %vm1242_vm6 = vweird.f32 %v1235_v45 }
 0x585   : > { %v1384_v58 = vpop.permute.xlu0 %1383 }
 0x586   : > { %1953 = vmatpush.xpose.msk.msra.mxu3 %vm910_vm1, %v1384_v58  ;;  %v1594_v58 = vld [vmem:[#allocation11 + $0x18] sm:$0xff] }
 0x587   : > { %v2120_v46 = vpop.eup %2119 }
 0x588   : > { %v1237_v47 = vmul.f32 %v2120_v46, %v1235_v45  ;;  %vm1243_vm5 = vweird.f32 %v2120_v46 }
 0x589   : > { %vm1244_vm7 = vmor %vm1242_vm6, %vm1243_vm5 }
 0x58a   : > { %v1238_v48 = vmul.f32 %v2120_v46, %v1237_v47 }
 0x58c   : > { %v1239_v49 = vmul.f32 0.5, %v1238_v48 }
 0x58d   : > { %v1449_v59 = vpop.permute.xlu0 %1448 }
 0x58e   : > { %v1240_v50 = vsub.f32 1.5, %v1239_v49  ;;  %1956 = vmatpush.xpose.msk.msra.mxu2 %vm910_vm1, %v1449_v59  ;;  %v1593_v59 = vld [vmem:[#allocation11 + $0x10] sm:$0xff] }
 0x590   : > { %v1241_v51 = vmul.f32 %v2120_v46, %v1240_v50 }
 0x592   : > { %v1245_v53 = vsel %vm1244_vm7, %v2120_v46, %v1241_v51 }
 0x593   : > { %v1246_v54 = vmul.f32 %v1245_v53, %v1229_v33 }
 0x595   : > { %v1250_v56 = vmul.f32 %v2090_v52, %v1246_v54  ;;  %v1514_v63 = vpop.permute.xlu0 %1513 }
 0x596   : > { %1959 = vmatpush.xpose.msk.msrb.mxu3 %vm910_vm1, %v1514_v63 }
 0x597   : > { %v2875_v57 = vadd.f32 %v2091_v55, %v1250_v56 }
 0x599   : > { %1949 = vmatmul.msk.f32.vlgmr.msrb.gmra.mxu0 %vm882_vm0, %v2875_v57 }
 0x616   : > { %v1314_v61 = vpop.f32.mrf.mxu0 }
 0x617   : > { %v1315_v62 = vadd.f32 %v2093_v60, %v1314_v61  ;;  %v1592_v60 = vld [vmem:[#allocation11 + $0x8] sm:$0xff]  ;;  %v1591_v61 = vld [vmem:[#allocation11] sm:$0xff] }
 0x619   : > { %1511 = vrot.lane.b32.xlu2 %v1315_v62, %s2448_s6  ;;  %1381 = vrot.lane.b32.xlu0 %v1315_v62, %s2443_s2  ;;  %s3094_s2 = smov 88  }
 0x61a   : > { %1951 = vmatmul.msk.f32.vlgmr.msrb.gmra.mxu2 %vm910_vm1, %v1315_v62 }
 0x61b   : > { %1614 = vmatpush.msrb.mxu2 %v1594_v58 }
 0x61d   : > { %1615 = vmatpush.msrb.mxu2 %v1593_v59 }
 0x61f   : > { %1616 = vmatpush.msrb.mxu2 %v1592_v60 }
 0x621   : > { %1446 = vrot.lane.b32.xlu0 %v1315_v62, %s2445_s28  ;;  %1617 = vmatpush.msrb.mxu2 %v1591_v61  ;;  %s3097_s28 = sld [smem:[#allocation39_spill]] }
 0x673   : > { %v1512_v1 = vpop.permute.xlu2 %1511 }
 0x68b   : > { %v1382_v0 = vpop.permute.xlu0 %1381 }
 0x68c   : > { %1954 = vmatmul.msk.f32.vlgmr.msra.gmra.mxu3 %vm910_vm1, %v1382_v0 }
 0x693   : > { %v1447_v2 = vpop.permute.xlu0 %1446 }
 0x694   : > { %1957 = vmatmul.msk.f32.vlgmr.msra.gmra.mxu2 %vm910_vm1, %v1447_v2  ;;  %1960 = vmatmul.msk.f32.vlgmr.msrb.gmra.mxu3 %vm910_vm1, %v1512_v1 }
 0x69d   : > { %v1341_v5 = vpop.f32.mrf.mxu2 }
 0x69e   : > { %v1342_v6 = vadd.f32 %v1341_v5, %v1317_v3  ;;  %v2094_v5 = vld [vmem:[%s3024_s15] ss:$0 sm:$0xff] }
 0x6a0   : > { %v1344_v7 = vsel %vm910_vm1, %v1342_v6, -inf }
 0x6a1   : > { %1345 = vmax.xlane.f32.xlu1 %v1344_v7 }
 0x70f   : > { %v1406_v8 = vpop.f32.mrf.mxu3 }
 0x710   : > { %v1407_v9 = vadd.f32 %v1406_v8, %v1317_v3 }
 0x712   : > { %v1409_v10 = vsel %vm910_vm1, %v1407_v9, -inf }
 0x713   : > { %1410 = vmax.xlane.f32.xlu0 %v1409_v10 }
 0x714   : > { %v1346_v11 = vpop.xlane.xlu1 %1345 }
 0x715   : > { %v1347_v12 = vsub.f32 %v1342_v6, %v1346_v11 }
 0x717   : > { %v1348_v13 = vmul.f32 1.442695, %v1347_v12  ;;  %v1471_v14 = vpop.f32.mrf.mxu2  ;;  %v1536_v17 = vpop.f32.mrf.mxu3 }
 0x718   : > { %v1472_v15 = vadd.f32 %v1471_v14, %v1317_v3  ;;  %v1537_v18 = vadd.f32 %v1536_v17, %v1317_v3  ;;  %v1656_v17 = vld [vmem:[#allocation13 + $0x8] sm:$0xff] }
 0x719   : > { %2121 = vpow2.f32 %v1348_v13 }
 0x71a   : > { %v1474_v16 = vsel %vm910_vm1, %v1472_v15, -inf  ;;  %v1539_v21 = vsel %vm910_vm1, %v1537_v18, -inf }
 0x71b   : > { %1475 = vmax.xlane.f32.xlu1 %v1474_v16  ;;  %v1657_v16 = vld [vmem:[#allocation13 + $0x10] sm:$0xff] }
 0x71f   : > { %v2122_v19 = vpop.eup %2121 }
 0x720   : > { %v1350_v20 = vsel %vm910_vm1, %v2122_v19, 0.0 }
 0x721   : > { %1351 = vadd.xlane.f32.xlu2 %v1350_v20  ;;  %v1692_v20 = vld [vmem:[%s3029_s20 + $0x28] sm:$0xff] }
 0x723   : > { %1540 = vmax.xlane.f32.xlu1 %v1539_v21 }
 0x739   : > { %1485 = vrot.lane.b32.xlu2 %v2858_v42, %s2446_s30 }
 0x73c   : > { %1355 = vrot.lane.b32.xlu1 %v2858_v42, %s2444_s17  ;;  %s3096_s17 = smov 8  }
 0x786   : > { %v1411_v22 = vpop.xlane.xlu0 %1410 }
 0x787   : > { %v1412_v23 = vsub.f32 %v1407_v9, %v1411_v22 }
 0x789   : > { %v1413_v24 = vmul.f32 1.442695, %v1412_v23  ;;  %v1691_v23 = vld [vmem:[%s3029_s20 + $0x20] sm:$0xff] }
 0x78b   : > { %2123 = vpow2.f32 %v1413_v24 }
 0x78e   : > { %v1476_v4 = vpop.xlane.xlu1 %1475 }
 0x78f   : > { %v1477_v25 = vsub.f32 %v1472_v15, %v1476_v4  ;;  %v1658_v15 = vld [vmem:[#allocation13 + $0x18] sm:$0xff]  ;;  %v1690_v4 = vld [vmem:[%s3029_s20 + $0x18] sm:$0xff] }
 0x791   : > { %v2124_v26 = vpop.eup %2123  ;;  %v1478_v27 = vmul.f32 1.442695, %v1477_v25 }
 0x792   : > { %v1415_v28 = vsel %vm910_vm1, %v2124_v26, 0.0 }
 0x793   : > { %2125 = vpow2.f32 %v1478_v27  ;;  %1416 = vadd.xlane.f32.xlu1 %v1415_v28 }
 0x794   : > { %v1352_v36 = vpop.xlane.xlu2 %1351 }
 0x796   : > { %v1541_v29 = vpop.xlane.xlu1 %1540 }
 0x797   : > { %v1542_v31 = vsub.f32 %v1537_v18, %v1541_v29  ;;  %v1655_v18 = vld [vmem:[#allocation13] sm:$0xff] }
 0x799   : > { %v2126_v32 = vpop.eup %2125  ;;  %v1543_v33 = vmul.f32 1.442695, %v1542_v31 }
 0x79a   : > { %v1480_v34 = vsel %vm910_vm1, %v2126_v32, 0.0 }
 0x79b   : > { %2127 = vpow2.f32 %v1543_v33  ;;  %1481 = vadd.xlane.f32.xlu1 %v1480_v34 }
 0x79c   : > { %2129 = vrcp.f32 %v1352_v36  ;;  %v1486_v41 = vpop.permute.xlu2 %1485 }
 0x7a1   : > { %v2128_v35 = vpop.eup %2127 }
 0x7a2   : > { %v1545_v37 = vsel %vm910_vm1, %v2128_v35, 0.0  ;;  %v2130_v38 = vpop.eup %2129 }
 0x7a3   : > { %1546 = vadd.xlane.f32.xlu0 %v1545_v37  ;;  %v1354_v39 = vmul.f32 %v2130_v38, %v2122_v19  ;;  %v1693_v19 = vld [vmem:[%s3029_s20 + $0x30] sm:$0xff] }
 0x7a4   : > { %v1689_v38 = vld [vmem:[%s3029_s20 + $0x10] sm:$0xff] }
 0x7ae   : > { %v1356_v40 = vpop.permute.xlu1 %1355 }
 0x7af   : > { %1376 = vmatpush.msrb.mxu1 %v1356_v40  ;;  %v1687_v40 = vld [vmem:[%s3029_s20] sm:$0xff] }
 0x7b0   : > { %1952 = vmatmul.msk.f32.vlgmr.msrb.gmra.mxu1 %vm910_vm1, %v1354_v39  ;;  %v1688_v39 = vld [vmem:[%s3029_s20 + $0x8] sm:$0xff] }
 0x7b1   : > { %1506 = vmatpush.msra.mxu1 %v1486_v41  ;;  %v2097_v41 = vld [vmem:[%s3098_s14] ss:$0 sm:$0xff] }
 0x7b3   : > { %1678 = vmatpush.msrb.mxu1 %v1658_v15 }
 0x7b4   : > { %1550 = vrot.lane.b32.xlu1 %v2858_v42, %s2442_s12  ;;  %s3095_s12 = smov 16  }
 0x7b5   : > { %1679 = vmatpush.msrb.mxu1 %v1657_v16 }
 0x7b7   : > { %1420 = vrot.lane.b32.xlu0 %v2858_v42, %s3094_s2  ;;  %1680 = vmatpush.msrb.mxu1 %v1656_v17  ;;  %s1966_s2 = sshll.u32 %s2606_s7, 3  ;;  %s871_s7 = scalar_lea.vmem [#allocation14], %s2726_s5 }
 0x7b8   : > { %s1770_s14 = sshll.u32 %s871_s7, 4  ;;  %s1771_s14 = int_to_ptr.vmem [resolvable:$true] %s1770_s14 }
 0x7b9   : > { %1681 = vmatpush.msrb.mxu1 %v1655_v18 }
 0x806   : > { %v1417_v43 = vpop.xlane.xlu1 %1416 }
 0x80e   : > { %v1482_v44 = vpop.xlane.xlu1 %1481 }
 0x80f   : > { %2131 = vrcp.f32 %v1482_v44 }
 0x810   : > { %2133 = vrcp.f32 %v1417_v43 }
 0x815   : > { %v2132_v45 = vpop.eup %2131 }
 0x816   : > { %v1484_v46 = vmul.f32 %v2132_v45, %v2126_v32  ;;  %v1547_v47 = vpop.xlane.xlu0 %1546  ;;  %v2134_v48 = vpop.eup %2133  ;;  %v2095_v32 = vld [vmem:[%s3025_s16] ss:$0 sm:$0xff] }
 0x817   : > { %2135 = vrcp.f32 %v1547_v47  ;;  %v1419_v49 = vmul.f32 %v2134_v48, %v2124_v26 }
 0x818   : > { %1958 = vmatmul.msk.f32.vlgmr.msra.gmra.mxu1 %vm910_vm1, %v1484_v46  ;;  %v2098_v46 = vld [vmem:[%s3099_s27] ss:$0 sm:$0xff] }
 0x81d   : > { %v2136_v52 = vpop.eup %2135 }
 0x81e   : > { %v1549_v42 = vmul.f32 %v2136_v52, %v2128_v35  ;;  %v2096_v35 = vld [vmem:[%s3097_s28] ss:$0 sm:$0xff]  ;;  %s3100_s28 = sld [smem:[#allocation43_spill]] }
 0x826   : > { %v1551_v51 = vpop.permute.xlu1 %1550 }
 0x829   : > { %v1421_v50 = vpop.permute.xlu0 %1420 }
 0x82a   : > { %1441 = vmatpush.msra.mxu0 %v1421_v50 }
 0x82b   : > { %1955 = vmatmul.msk.f32.vlgmr.msra.gmra.mxu0 %vm910_vm1, %v1419_v49 }
 0x82c   : > { %1571 = vmatpush.msrb.mxu0 %v1551_v51 }
 0x82d   : > { %v1378_v53 = vpop.f32.mrf.mxu1 }
 0x833   : > { %1961 = vmatmul.msk.f32.vlgmr.msrb.gmra.mxu0 %vm910_vm1, %v1549_v42 }
 0x895   : > { %v1508_v54 = vpop.f32.mrf.mxu1 }
 0x896   : > { %1581 = vrot.lane.b32.xlu1 %v1508_v54, %s3095_s12 }
 0x8a8   : > { %v1443_v55 = vpop.f32.mrf.mxu0 }
 0x8a9   : > { %1577 = vrot.lane.b32.xlu0 %v1443_v55, %s3096_s17 }
 0x8b0   : > { %v1573_v56 = vpop.f32.mrf.mxu0 }
 0x8b1   : > { %1585 = vrot.lane.b32.xlu0 %v1573_v56, %s2455_s3  ;;  %s3101_s3 = sld [smem:[#allocation45_spill]] }
 0x8b7   : > { %s1768_s25 = scalar_lea.hbm %s3101_s3, %s1966_s2  ;;  %s2371_s5 = scalar_lea.hbm %s3101_s3, 16 }
 0x8b8   : > { %s1772_s19 = sshll.u32 %s1768_s25, 4  ;;  %s1773_s19 = int_to_ptr.hbm [resolvable:$true] %s1772_s19 }
 0x8b9   : > { %s2365_s27 = sshra.s32 %s1773_s19, 4  ;;  %s2366_s27 = int_to_ptr.hbm [resolvable:$true] %s2365_s27 }
 0x8ba   : > { %s2367_s2 = scalar_lea.hbm %s2366_s27, 8  ;;  %p2372_p7 = scmp.lt.s32.totalorder %s2366_s27, %s3101_s3 }
 0x8bb   : > { %p2368_p1 = scmp.ne.s32.totalorder %s2366_s27, %s2367_s2  ;;  %p2373_p9 = scmp.lt.s32.totalorder %s2371_s5, %s2367_s2 }
 0x8bd   : > { %p2369_p3 = pnand %p2368_p1, %p2672_p0  ;;  %p2374_p8 = por %p2373_p9, %p2372_p7 }
 0x8bf   : > { %p2370_p13 = pneg %p2369_p3 }
 0x8c1   : > { %p2375_p10 = pnand %p2374_p8, %p2370_p13 }
 0x908   : > { %v1582_v0 = vpop.permute.xlu1 %1581 }
 0x91b   : > { %v1578_v62 = vpop.permute.xlu0 %1577 }
 0x91c   : > { %v1588_v63 = vsel %vm910_vm1, %v1378_v53, %v1578_v62 }
 0x91d   : > { %v1589_v2 = vsel %vm1180_vm2, %v1588_v63, %v1582_v0 }
 0x923   : > { %v1586_v1 = vpop.permute.xlu0 %1585 }
 0x924   : > { %v1590_v3 = vsel %vm1182_vm3, %v1589_v2, %v1586_v1  ;;  %v2099_v1 = vld [vmem:[%s3100_s28] ss:$0 sm:$0xff] }
 0x925   : > { %1962 = vmatmul.msk.f32.vlgmr.msrb.gmra.mxu2 %vm882_vm0, %v1590_v3  ;;  %v2100_v3 = vld [vmem:[%s3103_s21] ss:$0 sm:$0xff] }
 0x9a8   : > { %v1619_v6 = vpop.f32.mrf.mxu2 }
 0x9a9   : > { %v1620_v7 = vadd.f32 %v2094_v5, %v1619_v6 }
 0x9ab   : > { %v1622_v8 = vadd.f32 %v1620_v7, %v2875_v57  ;;  %v1694_v57 = vld [vmem:[%s3029_s20 + $0x38] sm:$0xff] }
 0x9ac   : > { %1711 = vmatpush.msra.mxu3 %v1694_v57 }
 0x9ad   : > { %v1625_v9 = vsel %vm882_vm0, %v1622_v8, 0.0 }
 0x9ae   : > { %1626 = vadd.xlane.f32.xlu1 %v1625_v9  ;;  %1712 = vmatpush.msra.mxu3 %v1693_v19 }
 0x9b0   : > { %1713 = vmatpush.msra.mxu3 %v1692_v20 }
 0x9b2   : > { %1714 = vmatpush.msra.mxu3 %v1691_v23 }
 0x9b4   : > { %1715 = vmatpush.msra.mxu3 %v1690_v4 }
 0x9b6   : > { %1716 = vmatpush.msra.mxu3 %v1689_v38 }
 0x9b8   : > { %1717 = vmatpush.msra.mxu3 %v1688_v39 }
 0x9ba   : > { %1718 = vmatpush.msra.mxu3 %v1687_v40 }
 0xa21   : > { %v1627_v10 = vpop.xlane.xlu1 %1626 }
 0xa22   : > { %v1628_v11 = vmul.f32 %v1627_v10, %v2851_v30 }
 0xa24   : > { %v1629_v12 = vsub.f32 %v1622_v8, %v1628_v11 }
 0xa26   : > { %v1630_v13 = vmul.f32 %v1629_v12, %v1629_v12 }
 0xa28   : > { %v1631_v14 = vsel %vm882_vm0, %v1630_v13, 0.0 }
 0xa29   : > { %1632 = vadd.xlane.f32.xlu2 %v1631_v14 }
 0xa9c   : > { %v1633_v21 = vpop.xlane.xlu2 %1632 }
 0xa9d   : > { %v1634_v22 = vmul.f32 %v1633_v21, %v2851_v30 }
 0xa9f   : > { %v1635_v24 = vadd.f32 1e-05, %v1634_v22 }
 0xaa1   : > { %2137 = vrsqrt.f32 %v1635_v24  ;;  %vm1642_vm9 = vweird.f32 %v1635_v24 }
 0xaa7   : > { %v2138_v25 = vpop.eup %2137 }
 0xaa8   : > { %v1637_v26 = vmul.f32 %v2138_v25, %v1635_v24  ;;  %vm1643_vm8 = vweird.f32 %v2138_v25 }
 0xaa9   : > { %vm1644_vm10 = vmor %vm1642_vm9, %vm1643_vm8 }
 0xaaa   : > { %v1638_v27 = vmul.f32 %v2138_v25, %v1637_v26 }
 0xaac   : > { %v1639_v28 = vmul.f32 0.5, %v1638_v27 }
 0xaae   : > { %v1640_v29 = vsub.f32 1.5, %v1639_v28 }
 0xab0   : > { %v1641_v31 = vmul.f32 %v2138_v25, %v1640_v29 }
 0xab2   : > { %v1645_v33 = vsel %vm1644_vm10, %v2138_v25, %v1641_v31 }
 0xab3   : > { %v1646_v34 = vmul.f32 %v1645_v33, %v1629_v12 }
 0xab5   : > { %v1650_v36 = vmul.f32 %v2095_v32, %v1646_v34 }
 0xab7   : > { %v1654_v37 = vadd.f32 %v2096_v35, %v1650_v36 }
 0xab9   : > { %1963 = vmatmul.msk.f32.vlgmr.msrb.gmra.mxu1 %vm882_vm0, %v1654_v37 }
 0xb36   : > { %v1683_v43 = vpop.f32.mrf.mxu1 }
 0xb37   : > { %v1684_v44 = vadd.f32 %v2097_v41, %v1683_v43 }
 0xb39   : > { %v1686_v45 = vmax.f32 %v1684_v44, 0.0 }
 0xb3b   : > { %1964 = vmatmul.msk.f32.vlgmr.msra.gmra.mxu3 %vm1699_vm11, %v1686_v45 }
 0xbbe   : > { %v1720_v47 = vpop.f32.mrf.mxu3 }
 0xbbf   : > { %v1721_v48 = vadd.f32 %v2098_v46, %v1720_v47 }
 0xbc1   : > { %v1723_v49 = vadd.f32 %v1721_v48, %v1654_v37 }
 0xbc3   : > { %v1726_v50 = vsel %vm882_vm0, %v1723_v49, 0.0 }
 0xbc4   : > { %1727 = vadd.xlane.f32.xlu0 %v1726_v50 }
 0xc37   : > { %v1728_v51 = vpop.xlane.xlu0 %1727 }
 0xc38   : > { %v1729_v52 = vmul.f32 %v1728_v51, %v2851_v30 }
 0xc3a   : > { %v1730_v42 = vsub.f32 %v1723_v49, %v1729_v52 }
 0xc3c   : > { %v1731_v53 = vmul.f32 %v1730_v42, %v1730_v42 }
 0xc3e   : > { %v1732_v54 = vsel %vm882_vm0, %v1731_v53, 0.0 }
 0xc3f   : > { %1733 = vadd.xlane.f32.xlu1 %v1732_v54 }
 0xcb2   : > { %v1734_v55 = vpop.xlane.xlu1 %1733 }
 0xcb3   : > { %v1735_v56 = vmul.f32 %v1734_v55, %v2851_v30 }
 0xcb5   : > { %v1736_v58 = vadd.f32 1e-05, %v1735_v56 }
 0xcb7   : > { %2139 = vrsqrt.f32 %v1736_v58  ;;  %vm1743_vm13 = vweird.f32 %v1736_v58 }
 0xcbd   : > { %v2140_v59 = vpop.eup %2139 }
 0xcbe   : > { %v1738_v60 = vmul.f32 %v2140_v59, %v1736_v58  ;;  %vm1744_vm12 = vweird.f32 %v2140_v59 }
 0xcbf   : > { %vm1745_vm14 = vmor %vm1743_vm13, %vm1744_vm12 }
 0xcc0   : > { %v1739_v61 = vmul.f32 %v2140_v59, %v1738_v60 }
 0xcc2   : > { %v1740_v62 = vmul.f32 0.5, %v1739_v61 }
 0xcc4   : > { %v1741_v63 = vsub.f32 1.5, %v1740_v62 }
 0xcc6   : > { %v1742_v0 = vmul.f32 %v2140_v59, %v1741_v63 }
 0xcc8   : > { %v1746_v30 = vsel %vm1745_vm14, %v2140_v59, %v1742_v0 }
 0xcc9   : > { %v1747_v2 = vmul.f32 %v1746_v30, %v1730_v42 }
 0xccb   : > { %v1751_v5 = vmul.f32 %v2099_v1, %v1747_v2 }
 0xccd   : > { %v1755_v6 = vadd.f32 %v2100_v3, %v1751_v5 }
 0xccf   : > { %1756 = vst.msk [vmem:[%s871_s7] sm:$0xff] %vm882_vm0, %v1755_v6 }
 0xcd0   : > { %2378 = shalt.err (!%p2375_p10)
}
 0xcd1   : > { %1993 = dma.vmem_to_hbm [thread:$0]  (%p2672_p0), %s1771_s14, 128, %s1773_s19, %s1758_s23  }
 0xcd2 PF: > { %s3104_s18 = sld [smem:[#allocation21_spill]] }
 0xcd3   : > { %s3106_s25 = sld [smem:[#allocation23_spill]] }
 0xcd8   : > { %s1784_s22 = sand.u32 1, %s3104_s18  }
 0xcd9   : > { %p3107_p12 = scmp.ge.s32.totalorder %s3106_s25, 2  ;;  %s1785_s0 = scalar_lea.sflag [#allocation4], %s1784_s22 }
 0xcdb   : > { %p2019_p4 = pnand %p3107_p12, %p2678_p6 }
 0xcdd   : > { %p2020_p11 = pneg %p2019_p4 }
 0xcdf   : > { %2416 = dma.done.wait (%p2020_p11), %s1785_s0, 128  }
 0xce0   : > { %2418 = vsyncadd (%p2020_p11), %s1785_s0, 4294967168  ;;  %s3108_s28 = sld [smem:[#allocation24_spill]]  ;;  %s3111_s5 = smov %s2425_s26 }
 0xce1   : > { %s3109_s21 = sld [smem:[#allocation22_spill]] }
 0xce2   : > { %s3110_s27 = sld [smem:[#allocation25_spill]] }
 0xce6   : > { %p42_p2 = scmp.ge.s32.totalorder %s3108_s28, 4  }
 0xce7   : > { %s3112_s26 = smov %s3109_s21 }
 0xce8   :  { %44 = sbr.rel (!%p42_p2) target bundleno = 28 (0x1c), region = 194 }
 0xced   :  { %1791 = vsyncpa [#allocation3], 1 }
 0xcee   :  { %1793 = vsyncpa [#allocation3 + $0x1], 1 }
 0xcef   :  { %1794 = vsyncpa [#allocation6], 1 }
 0xcf0   :  { %1796 = vsyncpa [#allocation6 + $0x1], 1 }
 0xcf1   :  { %1797 = vsyncpa [#allocation9], 1 }
 0xcf2   :  { %1798 = vsyncpa [#allocation12], 1 }
 0xcf3   :  { %1799 = vsyncpa [#allocation4], 1 }
 0xcf4   :  { %1801 = vsyncpa [#allocation4 + $0x1], 1 }

</bundles_post_ra>
